<compile_context>
chip_gen: v5e
topology: v5e:2x2
jax: 0.10.0
libtpu: 0.0.40
codegen_flags: <defaults>
</compile_context>

<pallas_src>
import functools

import jax
import jax.numpy as jnp
from jax import lax
from jax.experimental import pallas as pl
from jax.experimental.pallas import tpu as pltpu


def gru_tagger_kernel(emb_ref, wih_f_ref, wih_b_ref, whh_f_ref, whh_b_ref,
                      fcw_f_ref, fcw_b_ref, fcb_ref, out_ref,
                      gif_ref, gib_ref, hf_ref, hb_ref, *, Bp, L):
    """Bidirectional GRU (bias=False) + final Linear, fully VMEM-resident.

    emb_ref:        (L*Bp, E)      time-major flattened embeddings (row t*Bp + b)
    wih_f/b_ref:    (E, 3H)        input weights, gate column order [r | z | n]
    whh_f/b_ref:    (H, 3H)        hidden weights, gate column order [r | z | n]
    fcw_f/b_ref:    (H, Vt_pad)    final linear split for fwd / bwd halves (lane-padded)
    fcb_ref:        (1, Vt_pad)    final linear bias (lane-padded)
    out_ref:        (L*Bp, Vt_pad) logits
    gif/gib_ref:    (L*Bp, 3H)     scratch: precomputed input-gate projections
    hf/hb_ref:      (L*Bp, H)      scratch: per-step hidden states
    """
    H = whh_f_ref.shape[0]

    # ---- hoisted input projections: one large matmul per direction, outside the
    #      latency-critical recurrence chain.
    emb = emb_ref[...]
    gif_ref[...] = jnp.dot(emb, wih_f_ref[...], preferred_element_type=jnp.float32)
    gib_ref[...] = jnp.dot(emb, wih_b_ref[...], preferred_element_type=jnp.float32)

    # Hoist recurrent weights out of the loop (single VMEM load each).
    whh_f = whh_f_ref[...]
    whh_b = whh_b_ref[...]

    def gru_update(gi, h_prev, whh):
        # PyTorch GRU (bias=False), gates fused into one (H, 3H) matmul:
        #   gh = h_prev @ Whh_all           -> (Bp, 3H)
        #   r = sigmoid(gi_r + gh_r) ; z = sigmoid(gi_z + gh_z)
        #   n = tanh(gi_n + r * gh_n) ; h' = (1 - z) * n + z * h_prev
        gh = jnp.dot(h_prev, whh, preferred_element_type=jnp.float32)
        r = jax.nn.sigmoid(gi[:, 0:H] + gh[:, 0:H])
        z = jax.nn.sigmoid(gi[:, H:2 * H] + gh[:, H:2 * H])
        n = jnp.tanh(gi[:, 2 * H:3 * H] + r * gh[:, 2 * H:3 * H])
        return (1.0 - z) * n + z * h_prev

    h0 = jnp.zeros((Bp, H), jnp.float32)

    # ---- interleaved forward/backward recurrence: both directions advance each
    #      iteration (independent carries -> 2 chains in flight), fully unrolled.
    #      Bp is a multiple of 8 -> all row slices are sublane-aligned.
    def body(i, carry):
        h_f, h_b = carry
        tf = pl.multiple_of(i * Bp, Bp)              # forward timestep row offset
        tb = pl.multiple_of((L - 1 - i) * Bp, Bp)    # backward timestep row offset
        h_f = gru_update(gif_ref[pl.ds(tf, Bp), :], h_f, whh_f)
        h_b = gru_update(gib_ref[pl.ds(tb, Bp), :], h_b, whh_b)
        hf_ref[pl.ds(tf, Bp), :] = h_f
        hb_ref[pl.ds(tb, Bp), :] = h_b
        return (h_f, h_b)

    lax.fori_loop(0, L, body, (h0, h0), unroll=True)

    # TODO(synk): dropout is a no-op in eval mode; training-mode dropout not implemented.

    # ---- final projection: concat([h_fwd, h_bwd]) @ W_fc^T + b == hf@Wf + hb@Wb + b
    #      (output lane dim padded to a multiple of 128 -> unmasked stores).
    out_ref[...] = (
        jnp.dot(hf_ref[...], fcw_f_ref[...], preferred_element_type=jnp.float32)
        + jnp.dot(hb_ref[...], fcw_b_ref[...], preferred_element_type=jnp.float32)
        + fcb_ref[...])


def _full_spec(shape):
    zeros = (0,) * len(shape)
    return pl.BlockSpec(shape, lambda i, _z=zeros: _z)


def init_params(key, vocab_size_w, vocab_size_t, embedding_dim, hidden_dim, pad_id):
    ks = jax.random.split(key, 7)
    emb = jax.random.normal(ks[0], (vocab_size_w, embedding_dim), jnp.float32) * 0.1
    emb = emb.at[pad_id].set(0.0)  # padding_idx row is zero
    # PyTorch GRU weight layout: (3H, in), gate row order [r; z; n]
    w_ih_f = jax.random.normal(ks[1], (3 * hidden_dim, embedding_dim), jnp.float32) * 0.1
    w_hh_f = jax.random.normal(ks[2], (3 * hidden_dim, hidden_dim), jnp.float32) * 0.1
    w_ih_b = jax.random.normal(ks[3], (3 * hidden_dim, embedding_dim), jnp.float32) * 0.1
    w_hh_b = jax.random.normal(ks[4], (3 * hidden_dim, hidden_dim), jnp.float32) * 0.1
    fc_w = jax.random.normal(ks[5], (vocab_size_t, 2 * hidden_dim), jnp.float32) * 0.1
    fc_b = jax.random.normal(ks[6], (vocab_size_t,), jnp.float32) * 0.1
    return dict(emb=emb, w_ih_f=w_ih_f, w_hh_f=w_hh_f,
                w_ih_b=w_ih_b, w_hh_b=w_hh_b, fc_w=fc_w, fc_b=fc_b)


def model_forward(x, params, hidden_dim):
    """x: int32 (B, L) word ids -> logits (B, L, Vt). Matches PyTorch Model.forward (eval)."""
    H = hidden_dim
    emb_table = params["emb"]
    Vt = params["fc_w"].shape[0]
    B, L = x.shape
    E = emb_table.shape[1]
    Bp = pl.cdiv(B, 8) * 8            # sublane-aligned batch rows
    Vt_pad = pl.cdiv(Vt, 128) * 128   # lane-dense output width

    # Glue: embedding lookup + layout/param reshaping in plain JAX (XLA).
    embedded = jnp.take(emb_table, x, axis=0)                             # (B, L, E)
    emb_t = jnp.transpose(embedded, (1, 0, 2)).astype(jnp.float32)        # (L, B, E)
    emb_t = jnp.pad(emb_t, ((0, 0), (0, Bp - B), (0, 0)))                 # (L, Bp, E)
    emb_flat = emb_t.reshape(L * Bp, E)                                   # (L*Bp, E)

    # Fused gate weights, pre-transposed: (3H, in) -> (in, 3H), columns [r | z | n].
    wih_f = params["w_ih_f"].T.astype(jnp.float32)                        # (E, 3H)
    wih_b = params["w_ih_b"].T.astype(jnp.float32)
    whh_f = params["w_hh_f"].T.astype(jnp.float32)                        # (H, 3H)
    whh_b = params["w_hh_b"].T.astype(jnp.float32)

    fcw = params["fc_w"].astype(jnp.float32)                              # (Vt, 2H)
    fcw_f = jnp.zeros((H, Vt_pad), jnp.float32).at[:, :Vt].set(fcw[:, :H].T)
    fcw_b = jnp.zeros((H, Vt_pad), jnp.float32).at[:, :Vt].set(fcw[:, H:].T)
    fcb = jnp.zeros((1, Vt_pad), jnp.float32).at[0, :Vt].set(params["fc_b"])

    ins = (emb_flat, wih_f, wih_b, whh_f, whh_b, fcw_f, fcw_b, fcb)

    kern = functools.partial(gru_tagger_kernel, Bp=Bp, L=L)

    out_flat = pl.pallas_call(
        kern,
        out_shape=jax.ShapeDtypeStruct((L * Bp, Vt_pad), jnp.float32),
        grid=(1,),
        in_specs=[_full_spec(a.shape) for a in ins],
        out_specs=_full_spec((L * Bp, Vt_pad)),
        scratch_shapes=[pltpu.VMEM((L * Bp, 3 * H), jnp.float32),   # gi forward
                        pltpu.VMEM((L * Bp, 3 * H), jnp.float32),   # gi backward
                        pltpu.VMEM((L * Bp, H), jnp.float32),       # h forward
                        pltpu.VMEM((L * Bp, H), jnp.float32)],      # h backward
        compiler_params=pltpu.CompilerParams(dimension_semantics=("arbitrary",)),
    )(*ins)

    out = out_flat.reshape(L, Bp, Vt_pad)[:, :B, :Vt]                     # (L, B, Vt)
    return jnp.transpose(out, (1, 0, 2))                                  # (B, L, Vt)


def reference_forward(x, params, hidden_dim):
    """Pure-JAX reference matching PyTorch semantics (eval mode)."""
    H = hidden_dim
    embedded = jnp.take(params["emb"], x, axis=0)              # (B, L, E)
    emb_t = jnp.transpose(embedded, (1, 0, 2))                 # (L, B, E)
    B = x.shape[0]

    def make_step(w_ih, w_hh):
        def step(h, x_t):
            gi = x_t @ w_ih.T
            gh = h @ w_hh.T
            r = jax.nn.sigmoid(gi[:, :H] + gh[:, :H])
            z = jax.nn.sigmoid(gi[:, H:2 * H] + gh[:, H:2 * H])
            n = jnp.tanh(gi[:, 2 * H:] + r * gh[:, 2 * H:])
            h_new = (1.0 - z) * n + z * h
            return h_new, h_new
        return step

    h0 = jnp.zeros((B, H), jnp.float32)
    _, hf = lax.scan(make_step(params["w_ih_f"], params["w_hh_f"]), h0, emb_t)
    _, hb_rev = lax.scan(make_step(params["w_ih_b"], params["w_hh_b"]), h0, emb_t[::-1])
    hb = hb_rev[::-1]
    gru_out = jnp.concatenate([hf, hb], axis=-1)               # (L, B, 2H)
    out = gru_out @ params["fc_w"].T + params["fc_b"]          # (L, B, Vt)
    return jnp.transpose(out, (1, 0, 2))                       # (B, L, Vt)


if __name__ == "__main__":
    vocab_size_w, vocab_size_t = 50, 12
    embedding_dim, hidden_dim = 32, 32
    dropout_rate, pad_id = 0.1, 0
    B, L = 2, 8

    key = jax.random.PRNGKey(0)
    pkey, xkey = jax.random.split(key)
    params = init_params(pkey, vocab_size_w, vocab_size_t, embedding_dim, hidden_dim, pad_id)

    x = jax.random.randint(xkey, (B, L), minval=1, maxval=vocab_size_w, dtype=jnp.int32)
    x = x.at[0, L - 1].set(pad_id)  # exercise the padding_idx row

    out = jax.block_until_ready(model_forward(x, params, hidden_dim))
    ref = jax.block_until_ready(reference_forward(x, params, hidden_dim))

    assert out.shape == (B, L, vocab_size_t)
    assert jnp.allclose(out, ref, atol=1e-4, rtol=1e-4), "mismatch vs pure-JAX reference"
    print("KERNEL_OK")
</pallas_src>

<mosaic_0001>
module attributes {stable_mosaic.version = 11 : i64} {
  func.func @gru_tagger_kernel(%arg0: i32, %arg1: memref<64x32xf32, #tpu.memory_space<vmem>>, %arg2: memref<32x96xf32, #tpu.memory_space<vmem>>, %arg3: memref<32x96xf32, #tpu.memory_space<vmem>>, %arg4: memref<32x96xf32, #tpu.memory_space<vmem>>, %arg5: memref<32x96xf32, #tpu.memory_space<vmem>>, %arg6: memref<32x128xf32, #tpu.memory_space<vmem>>, %arg7: memref<32x128xf32, #tpu.memory_space<vmem>>, %arg8: memref<1x128xf32, #tpu.memory_space<vmem>>, %arg9: memref<64x128xf32, #tpu.memory_space<vmem>>, %arg10: memref<64x96xf32, #tpu.memory_space<vmem>>, %arg11: memref<64x96xf32, #tpu.memory_space<vmem>>, %arg12: memref<64x32xf32, #tpu.memory_space<vmem>>, %arg13: memref<64x32xf32, #tpu.memory_space<vmem>>) attributes {dimension_semantics = [#tpu.dimension_semantics<arbitrary>], iteration_bounds = array<i64: 1>, scalar_prefetch = 0 : i64, scratch_operands = 4 : i64, tpu.core_type = #tpu.core_type<tc>, window_params = [{pipeline_mode = #tpu.pipeline_mode<synchronous>, transform_indices = @transform_0, window_bounds = array<i64: 64, 32>}, {pipeline_mode = #tpu.pipeline_mode<synchronous>, transform_indices = @transform_1, window_bounds = array<i64: 32, 96>}, {pipeline_mode = #tpu.pipeline_mode<synchronous>, transform_indices = @transform_2, window_bounds = array<i64: 32, 96>}, {pipeline_mode = #tpu.pipeline_mode<synchronous>, transform_indices = @transform_3, window_bounds = array<i64: 32, 96>}, {pipeline_mode = #tpu.pipeline_mode<synchronous>, transform_indices = @transform_4, window_bounds = array<i64: 32, 96>}, {pipeline_mode = #tpu.pipeline_mode<synchronous>, transform_indices = @transform_5, window_bounds = array<i64: 32, 128>}, {pipeline_mode = #tpu.pipeline_mode<synchronous>, transform_indices = @transform_6, window_bounds = array<i64: 32, 128>}, {pipeline_mode = #tpu.pipeline_mode<synchronous>, transform_indices = @transform_7, window_bounds = array<i64: 1, 128>}, {pipeline_mode = #tpu.pipeline_mode<synchronous>, transform_indices = @transform_8, window_bounds = array<i64: 64, 128>}]} {
    %c0 = arith.constant 0 : index
    %c0_0 = arith.constant 0 : index
    %0 = vector.load %arg1[%c0, %c0_0] : memref<64x32xf32, #tpu.memory_space<vmem>>, vector<64x32xf32>
    %c0_1 = arith.constant 0 : index
    %c0_2 = arith.constant 0 : index
    %1 = vector.load %arg2[%c0_1, %c0_2] : memref<32x96xf32, #tpu.memory_space<vmem>>, vector<32x96xf32>
    %cst = arith.constant dense<0.000000e+00> : vector<64x96xf32>
    %2 = tpu.matmul %0, %1, %cst {dimension_numbers = #tpu.dot_dimension_numbers<[1], [0], [0], [1], [0, 0, 1, 1], [], []>} : vector<64x32xf32>, vector<32x96xf32>, vector<64x96xf32> -> vector<64x96xf32>
    %c0_3 = arith.constant 0 : index
    %c0_4 = arith.constant 0 : index
    %3 = vector.load %arg10[%c0_3, %c0_4] : memref<64x96xf32, #tpu.memory_space<vmem>>, vector<64x96xf32>
    tpu.vector_store %arg10[%c0_3, %c0_4], %2 {strides = array<i32>} : memref<64x96xf32, #tpu.memory_space<vmem>>, vector<64x96xf32>,
    %c0_5 = arith.constant 0 : index
    %c0_6 = arith.constant 0 : index
    %4 = vector.load %arg3[%c0_5, %c0_6] : memref<32x96xf32, #tpu.memory_space<vmem>>, vector<32x96xf32>
    %cst_7 = arith.constant dense<0.000000e+00> : vector<64x96xf32>
    %5 = tpu.matmul %0, %4, %cst_7 {dimension_numbers = #tpu.dot_dimension_numbers<[1], [0], [0], [1], [0, 0, 1, 1], [], []>} : vector<64x32xf32>, vector<32x96xf32>, vector<64x96xf32> -> vector<64x96xf32>
    %c0_8 = arith.constant 0 : index
    %c0_9 = arith.constant 0 : index
    %6 = vector.load %arg11[%c0_8, %c0_9] : memref<64x96xf32, #tpu.memory_space<vmem>>, vector<64x96xf32>
    tpu.vector_store %arg11[%c0_8, %c0_9], %5 {strides = array<i32>} : memref<64x96xf32, #tpu.memory_space<vmem>>, vector<64x96xf32>,
    %c0_10 = arith.constant 0 : index
    %c0_11 = arith.constant 0 : index
    %7 = vector.load %arg4[%c0_10, %c0_11] : memref<32x96xf32, #tpu.memory_space<vmem>>, vector<32x96xf32>
    %c0_12 = arith.constant 0 : index
    %c0_13 = arith.constant 0 : index
    %8 = vector.load %arg5[%c0_12, %c0_13] : memref<32x96xf32, #tpu.memory_space<vmem>>, vector<32x96xf32>
    %cst_14 = arith.constant 0.000000e+00 : f32
    %9 = vector.broadcast %cst_14 : f32 to vector<8x32xf32>
    %c0_i32 = arith.constant 0 : i32
    %c8_i32 = arith.constant 8 : i32
    %10 = arith.muli %c0_i32, %c8_i32 : i32
    %11 = tpu.assume_multiple %10, 8 : i32
    %c7_i32 = arith.constant 7 : i32
    %12 = arith.subi %c7_i32, %c0_i32 : i32
    %c8_i32_15 = arith.constant 8 : i32
    %13 = arith.muli %12, %c8_i32_15 : i32
    %14 = tpu.assume_multiple %13, 8 : i32
    %15 = arith.index_cast %11 : i32 to index
    %c0_16 = arith.constant 0 : index
    %16 = vector.load %arg10[%15, %c0_16] : memref<64x96xf32, #tpu.memory_space<vmem>>, vector<8x96xf32>
    %cst_17 = arith.constant dense<0.000000e+00> : vector<8x96xf32>
    %17 = tpu.matmul %9, %7, %cst_17 {dimension_numbers = #tpu.dot_dimension_numbers<[1], [0], [0], [1], [0, 0, 1, 1], [], []>} : vector<8x32xf32>, vector<32x96xf32>, vector<8x96xf32> -> vector<8x96xf32>
    %18 = vector.extract_strided_slice %16 {offsets = [0, 0], sizes = [8, 32], strides = [1, 1]} : vector<8x96xf32> to vector<8x32xf32>
    %19 = vector.extract_strided_slice %17 {offsets = [0, 0], sizes = [8, 32], strides = [1, 1]} : vector<8x96xf32> to vector<8x32xf32>
    %20 = arith.addf %18, %19 : vector<8x32xf32>
    %21 = arith.negf %20 : vector<8x32xf32>
    %22 = math.exp %21 : vector<8x32xf32>
    %cst_18 = arith.constant 1.000000e+00 : f32
    %23 = vector.broadcast %cst_18 : f32 to vector<8x32xf32>
    %24 = arith.addf %23, %22 : vector<8x32xf32>
    %25 = arith.divf %23, %24 : vector<8x32xf32>
    %26 = vector.extract_strided_slice %16 {offsets = [0, 32], sizes = [8, 32], strides = [1, 1]} : vector<8x96xf32> to vector<8x32xf32>
    %27 = vector.extract_strided_slice %17 {offsets = [0, 32], sizes = [8, 32], strides = [1, 1]} : vector<8x96xf32> to vector<8x32xf32>
    %28 = arith.addf %26, %27 : vector<8x32xf32>
    %29 = arith.negf %28 : vector<8x32xf32>
    %30 = math.exp %29 : vector<8x32xf32>
    %cst_19 = arith.constant 1.000000e+00 : f32
    %31 = vector.broadcast %cst_19 : f32 to vector<8x32xf32>
    %32 = arith.addf %31, %30 : vector<8x32xf32>
    %33 = arith.divf %31, %32 : vector<8x32xf32>
    %34 = vector.extract_strided_slice %16 {offsets = [0, 64], sizes = [8, 32], strides = [1, 1]} : vector<8x96xf32> to vector<8x32xf32>
    %35 = vector.extract_strided_slice %17 {offsets = [0, 64], sizes = [8, 32], strides = [1, 1]} : vector<8x96xf32> to vector<8x32xf32>
    %36 = arith.mulf %25, %35 : vector<8x32xf32>
    %37 = arith.addf %34, %36 : vector<8x32xf32>
    %38 = math.tanh %37 : vector<8x32xf32>
    %cst_20 = arith.constant 1.000000e+00 : f32
    %39 = vector.broadcast %cst_20 : f32 to vector<8x32xf32>
    %40 = arith.subf %39, %33 : vector<8x32xf32>
    %41 = arith.mulf %40, %38 : vector<8x32xf32>
    %42 = arith.mulf %33, %9 : vector<8x32xf32>
    %43 = arith.addf %41, %42 : vector<8x32xf32>
    %44 = arith.index_cast %14 : i32 to index
    %c0_21 = arith.constant 0 : index
    %45 = vector.load %arg11[%44, %c0_21] : memref<64x96xf32, #tpu.memory_space<vmem>>, vector<8x96xf32>
    %cst_22 = arith.constant dense<0.000000e+00> : vector<8x96xf32>
    %46 = tpu.matmul %9, %8, %cst_22 {dimension_numbers = #tpu.dot_dimension_numbers<[1], [0], [0], [1], [0, 0, 1, 1], [], []>} : vector<8x32xf32>, vector<32x96xf32>, vector<8x96xf32> -> vector<8x96xf32>
    %47 = vector.extract_strided_slice %45 {offsets = [0, 0], sizes = [8, 32], strides = [1, 1]} : vector<8x96xf32> to vector<8x32xf32>
    %48 = vector.extract_strided_slice %46 {offsets = [0, 0], sizes = [8, 32], strides = [1, 1]} : vector<8x96xf32> to vector<8x32xf32>
    %49 = arith.addf %47, %48 : vector<8x32xf32>
    %50 = arith.negf %49 : vector<8x32xf32>
    %51 = math.exp %50 : vector<8x32xf32>
    %cst_23 = arith.constant 1.000000e+00 : f32
    %52 = vector.broadcast %cst_23 : f32 to vector<8x32xf32>
    %53 = arith.addf %52, %51 : vector<8x32xf32>
    %54 = arith.divf %52, %53 : vector<8x32xf32>
    %55 = vector.extract_strided_slice %45 {offsets = [0, 32], sizes = [8, 32], strides = [1, 1]} : vector<8x96xf32> to vector<8x32xf32>
    %56 = vector.extract_strided_slice %46 {offsets = [0, 32], sizes = [8, 32], strides = [1, 1]} : vector<8x96xf32> to vector<8x32xf32>
    %57 = arith.addf %55, %56 : vector<8x32xf32>
    %58 = arith.negf %57 : vector<8x32xf32>
    %59 = math.exp %58 : vector<8x32xf32>
    %cst_24 = arith.constant 1.000000e+00 : f32
    %60 = vector.broadcast %cst_24 : f32 to vector<8x32xf32>
    %61 = arith.addf %60, %59 : vector<8x32xf32>
    %62 = arith.divf %60, %61 : vector<8x32xf32>
    %63 = vector.extract_strided_slice %45 {offsets = [0, 64], sizes = [8, 32], strides = [1, 1]} : vector<8x96xf32> to vector<8x32xf32>
    %64 = vector.extract_strided_slice %46 {offsets = [0, 64], sizes = [8, 32], strides = [1, 1]} : vector<8x96xf32> to vector<8x32xf32>
    %65 = arith.mulf %54, %64 : vector<8x32xf32>
    %66 = arith.addf %63, %65 : vector<8x32xf32>
    %67 = math.tanh %66 : vector<8x32xf32>
    %cst_25 = arith.constant 1.000000e+00 : f32
    %68 = vector.broadcast %cst_25 : f32 to vector<8x32xf32>
    %69 = arith.subf %68, %62 : vector<8x32xf32>
    %70 = arith.mulf %69, %67 : vector<8x32xf32>
    %71 = arith.mulf %62, %9 : vector<8x32xf32>
    %72 = arith.addf %70, %71 : vector<8x32xf32>
    %73 = arith.index_cast %11 : i32 to index
    %c0_26 = arith.constant 0 : index
    %74 = vector.load %arg12[%73, %c0_26] : memref<64x32xf32, #tpu.memory_space<vmem>>, vector<8x32xf32>
    tpu.vector_store %arg12[%73, %c0_26], %43 {strides = array<i32>} : memref<64x32xf32, #tpu.memory_space<vmem>>, vector<8x32xf32>,
    %75 = arith.index_cast %14 : i32 to index
    %c0_27 = arith.constant 0 : index
    %76 = vector.load %arg13[%75, %c0_27] : memref<64x32xf32, #tpu.memory_space<vmem>>, vector<8x32xf32>
    tpu.vector_store %arg13[%75, %c0_27], %72 {strides = array<i32>} : memref<64x32xf32, #tpu.memory_space<vmem>>, vector<8x32xf32>,
    %c1_i32 = arith.constant 1 : i32
    %c8_i32_28 = arith.constant 8 : i32
    %77 = arith.muli %c1_i32, %c8_i32_28 : i32
    %78 = tpu.assume_multiple %77, 8 : i32
    %c7_i32_29 = arith.constant 7 : i32
    %79 = arith.subi %c7_i32_29, %c1_i32 : i32
    %c8_i32_30 = arith.constant 8 : i32
    %80 = arith.muli %79, %c8_i32_30 : i32
    %81 = tpu.assume_multiple %80, 8 : i32
    %82 = arith.index_cast %78 : i32 to index
    %c0_31 = arith.constant 0 : index
    %83 = vector.load %arg10[%82, %c0_31] : memref<64x96xf32, #tpu.memory_space<vmem>>, vector<8x96xf32>
    %cst_32 = arith.constant dense<0.000000e+00> : vector<8x96xf32>
    %84 = tpu.matmul %43, %7, %cst_32 {dimension_numbers = #tpu.dot_dimension_numbers<[1], [0], [0], [1], [0, 0, 1, 1], [], []>} : vector<8x32xf32>, vector<32x96xf32>, vector<8x96xf32> -> vector<8x96xf32>
    %85 = vector.extract_strided_slice %83 {offsets = [0, 0], sizes = [8, 32], strides = [1, 1]} : vector<8x96xf32> to vector<8x32xf32>
    %86 = vector.extract_strided_slice %84 {offsets = [0, 0], sizes = [8, 32], strides = [1, 1]} : vector<8x96xf32> to vector<8x32xf32>
    %87 = arith.addf %85, %86 : vector<8x32xf32>
    %88 = arith.negf %87 : vector<8x32xf32>
    %89 = math.exp %88 : vector<8x32xf32>
    %cst_33 = arith.constant 1.000000e+00 : f32
    %90 = vector.broadcast %cst_33 : f32 to vector<8x32xf32>
    %91 = arith.addf %90, %89 : vector<8x32xf32>
    %92 = arith.divf %90, %91 : vector<8x32xf32>
    %93 = vector.extract_strided_slice %83 {offsets = [0, 32], sizes = [8, 32], strides = [1, 1]} : vector<8x96xf32> to vector<8x32xf32>
    %94 = vector.extract_strided_slice %84 {offsets = [0, 32], sizes = [8, 32], strides = [1, 1]} : vector<8x96xf32> to vector<8x32xf32>
    %95 = arith.addf %93, %94 : vector<8x32xf32>
    %96 = arith.negf %95 : vector<8x32xf32>
    %97 = math.exp %96 : vector<8x32xf32>
    %cst_34 = arith.constant 1.000000e+00 : f32
    %98 = vector.broadcast %cst_34 : f32 to vector<8x32xf32>
    %99 = arith.addf %98, %97 : vector<8x32xf32>
    %100 = arith.divf %98, %99 : vector<8x32xf32>
    %101 = vector.extract_strided_slice %83 {offsets = [0, 64], sizes = [8, 32], strides = [1, 1]} : vector<8x96xf32> to vector<8x32xf32>
    %102 = vector.extract_strided_slice %84 {offsets = [0, 64], sizes = [8, 32], strides = [1, 1]} : vector<8x96xf32> to vector<8x32xf32>
    %103 = arith.mulf %92, %102 : vector<8x32xf32>
    %104 = arith.addf %101, %103 : vector<8x32xf32>
    %105 = math.tanh %104 : vector<8x32xf32>
    %cst_35 = arith.constant 1.000000e+00 : f32
    %106 = vector.broadcast %cst_35 : f32 to vector<8x32xf32>
    %107 = arith.subf %106, %100 : vector<8x32xf32>
    %108 = arith.mulf %107, %105 : vector<8x32xf32>
    %109 = arith.mulf %100, %43 : vector<8x32xf32>
    %110 = arith.addf %108, %109 : vector<8x32xf32>
    %111 = arith.index_cast %81 : i32 to index
    %c0_36 = arith.constant 0 : index
    %112 = vector.load %arg11[%111, %c0_36] : memref<64x96xf32, #tpu.memory_space<vmem>>, vector<8x96xf32>
    %cst_37 = arith.constant dense<0.000000e+00> : vector<8x96xf32>
    %113 = tpu.matmul %72, %8, %cst_37 {dimension_numbers = #tpu.dot_dimension_numbers<[1], [0], [0], [1], [0, 0, 1, 1], [], []>} : vector<8x32xf32>, vector<32x96xf32>, vector<8x96xf32> -> vector<8x96xf32>
    %114 = vector.extract_strided_slice %112 {offsets = [0, 0], sizes = [8, 32], strides = [1, 1]} : vector<8x96xf32> to vector<8x32xf32>
    %115 = vector.extract_strided_slice %113 {offsets = [0, 0], sizes = [8, 32], strides = [1, 1]} : vector<8x96xf32> to vector<8x32xf32>
    %116 = arith.addf %114, %115 : vector<8x32xf32>
    %117 = arith.negf %116 : vector<8x32xf32>
    %118 = math.exp %117 : vector<8x32xf32>
    %cst_38 = arith.constant 1.000000e+00 : f32
    %119 = vector.broadcast %cst_38 : f32 to vector<8x32xf32>
    %120 = arith.addf %119, %118 : vector<8x32xf32>
    %121 = arith.divf %119, %120 : vector<8x32xf32>
    %122 = vector.extract_strided_slice %112 {offsets = [0, 32], sizes = [8, 32], strides = [1, 1]} : vector<8x96xf32> to vector<8x32xf32>
    %123 = vector.extract_strided_slice %113 {offsets = [0, 32], sizes = [8, 32], strides = [1, 1]} : vector<8x96xf32> to vector<8x32xf32>
    %124 = arith.addf %122, %123 : vector<8x32xf32>
    %125 = arith.negf %124 : vector<8x32xf32>
    %126 = math.exp %125 : vector<8x32xf32>
    %cst_39 = arith.constant 1.000000e+00 : f32
    %127 = vector.broadcast %cst_39 : f32 to vector<8x32xf32>
    %128 = arith.addf %127, %126 : vector<8x32xf32>
    %129 = arith.divf %127, %128 : vector<8x32xf32>
    %130 = vector.extract_strided_slice %112 {offsets = [0, 64], sizes = [8, 32], strides = [1, 1]} : vector<8x96xf32> to vector<8x32xf32>
    %131 = vector.extract_strided_slice %113 {offsets = [0, 64], sizes = [8, 32], strides = [1, 1]} : vector<8x96xf32> to vector<8x32xf32>
    %132 = arith.mulf %121, %131 : vector<8x32xf32>
    %133 = arith.addf %130, %132 : vector<8x32xf32>
    %134 = math.tanh %133 : vector<8x32xf32>
    %cst_40 = arith.constant 1.000000e+00 : f32
    %135 = vector.broadcast %cst_40 : f32 to vector<8x32xf32>
    %136 = arith.subf %135, %129 : vector<8x32xf32>
    %137 = arith.mulf %136, %134 : vector<8x32xf32>
    %138 = arith.mulf %129, %72 : vector<8x32xf32>
    %139 = arith.addf %137, %138 : vector<8x32xf32>
    %140 = arith.index_cast %78 : i32 to index
    %c0_41 = arith.constant 0 : index
    %141 = vector.load %arg12[%140, %c0_41] : memref<64x32xf32, #tpu.memory_space<vmem>>, vector<8x32xf32>
    tpu.vector_store %arg12[%140, %c0_41], %110 {strides = array<i32>} : memref<64x32xf32, #tpu.memory_space<vmem>>, vector<8x32xf32>,
    %142 = arith.index_cast %81 : i32 to index
    %c0_42 = arith.constant 0 : index
    %143 = vector.load %arg13[%142, %c0_42] : memref<64x32xf32, #tpu.memory_space<vmem>>, vector<8x32xf32>
    tpu.vector_store %arg13[%142, %c0_42], %139 {strides = array<i32>} : memref<64x32xf32, #tpu.memory_space<vmem>>, vector<8x32xf32>,
    %c2_i32 = arith.constant 2 : i32
    %c8_i32_43 = arith.constant 8 : i32
    %144 = arith.muli %c2_i32, %c8_i32_43 : i32
    %145 = tpu.assume_multiple %144, 8 : i32
    %c7_i32_44 = arith.constant 7 : i32
    %146 = arith.subi %c7_i32_44, %c2_i32 : i32
    %c8_i32_45 = arith.constant 8 : i32
    %147 = arith.muli %146, %c8_i32_45 : i32
    %148 = tpu.assume_multiple %147, 8 : i32
    %149 = arith.index_cast %145 : i32 to index
    %c0_46 = arith.constant 0 : index
    %150 = vector.load %arg10[%149, %c0_46] : memref<64x96xf32, #tpu.memory_space<vmem>>, vector<8x96xf32>
    %cst_47 = arith.constant dense<0.000000e+00> : vector<8x96xf32>
    %151 = tpu.matmul %110, %7, %cst_47 {dimension_numbers = #tpu.dot_dimension_numbers<[1], [0], [0], [1], [0, 0, 1, 1], [], []>} : vector<8x32xf32>, vector<32x96xf32>, vector<8x96xf32> -> vector<8x96xf32>
    %152 = vector.extract_strided_slice %150 {offsets = [0, 0], sizes = [8, 32], strides = [1, 1]} : vector<8x96xf32> to vector<8x32xf32>
    %153 = vector.extract_strided_slice %151 {offsets = [0, 0], sizes = [8, 32], strides = [1, 1]} : vector<8x96xf32> to vector<8x32xf32>
    %154 = arith.addf %152, %153 : vector<8x32xf32>
    %155 = arith.negf %154 : vector<8x32xf32>
    %156 = math.exp %155 : vector<8x32xf32>
    %cst_48 = arith.constant 1.000000e+00 : f32
    %157 = vector.broadcast %cst_48 : f32 to vector<8x32xf32>
    %158 = arith.addf %157, %156 : vector<8x32xf32>
    %159 = arith.divf %157, %158 : vector<8x32xf32>
    %160 = vector.extract_strided_slice %150 {offsets = [0, 32], sizes = [8, 32], strides = [1, 1]} : vector<8x96xf32> to vector<8x32xf32>
    %161 = vector.extract_strided_slice %151 {offsets = [0, 32], sizes = [8, 32], strides = [1, 1]} : vector<8x96xf32> to vector<8x32xf32>
    %162 = arith.addf %160, %161 : vector<8x32xf32>
    %163 = arith.negf %162 : vector<8x32xf32>
    %164 = math.exp %163 : vector<8x32xf32>
    %cst_49 = arith.constant 1.000000e+00 : f32
    %165 = vector.broadcast %cst_49 : f32 to vector<8x32xf32>
    %166 = arith.addf %165, %164 : vector<8x32xf32>
    %167 = arith.divf %165, %166 : vector<8x32xf32>
    %168 = vector.extract_strided_slice %150 {offsets = [0, 64], sizes = [8, 32], strides = [1, 1]} : vector<8x96xf32> to vector<8x32xf32>
    %169 = vector.extract_strided_slice %151 {offsets = [0, 64], sizes = [8, 32], strides = [1, 1]} : vector<8x96xf32> to vector<8x32xf32>
    %170 = arith.mulf %159, %169 : vector<8x32xf32>
    %171 = arith.addf %168, %170 : vector<8x32xf32>
    %172 = math.tanh %171 : vector<8x32xf32>
    %cst_50 = arith.constant 1.000000e+00 : f32
    %173 = vector.broadcast %cst_50 : f32 to vector<8x32xf32>
    %174 = arith.subf %173, %167 : vector<8x32xf32>
    %175 = arith.mulf %174, %172 : vector<8x32xf32>
    %176 = arith.mulf %167, %110 : vector<8x32xf32>
    %177 = arith.addf %175, %176 : vector<8x32xf32>
    %178 = arith.index_cast %148 : i32 to index
    %c0_51 = arith.constant 0 : index
    %179 = vector.load %arg11[%178, %c0_51] : memref<64x96xf32, #tpu.memory_space<vmem>>, vector<8x96xf32>
    %cst_52 = arith.constant dense<0.000000e+00> : vector<8x96xf32>
    %180 = tpu.matmul %139, %8, %cst_52 {dimension_numbers = #tpu.dot_dimension_numbers<[1], [0], [0], [1], [0, 0, 1, 1], [], []>} : vector<8x32xf32>, vector<32x96xf32>, vector<8x96xf32> -> vector<8x96xf32>
    %181 = vector.extract_strided_slice %179 {offsets = [0, 0], sizes = [8, 32], strides = [1, 1]} : vector<8x96xf32> to vector<8x32xf32>
    %182 = vector.extract_strided_slice %180 {offsets = [0, 0], sizes = [8, 32], strides = [1, 1]} : vector<8x96xf32> to vector<8x32xf32>
    %183 = arith.addf %181, %182 : vector<8x32xf32>
    %184 = arith.negf %183 : vector<8x32xf32>
    %185 = math.exp %184 : vector<8x32xf32>
    %cst_53 = arith.constant 1.000000e+00 : f32
    %186 = vector.broadcast %cst_53 : f32 to vector<8x32xf32>
    %187 = arith.addf %186, %185 : vector<8x32xf32>
    %188 = arith.divf %186, %187 : vector<8x32xf32>
    %189 = vector.extract_strided_slice %179 {offsets = [0, 32], sizes = [8, 32], strides = [1, 1]} : vector<8x96xf32> to vector<8x32xf32>
    %190 = vector.extract_strided_slice %180 {offsets = [0, 32], sizes = [8, 32], strides = [1, 1]} : vector<8x96xf32> to vector<8x32xf32>
    %191 = arith.addf %189, %190 : vector<8x32xf32>
    %192 = arith.negf %191 : vector<8x32xf32>
    %193 = math.exp %192 : vector<8x32xf32>
    %cst_54 = arith.constant 1.000000e+00 : f32
    %194 = vector.broadcast %cst_54 : f32 to vector<8x32xf32>
    %195 = arith.addf %194, %193 : vector<8x32xf32>
    %196 = arith.divf %194, %195 : vector<8x32xf32>
    %197 = vector.extract_strided_slice %179 {offsets = [0, 64], sizes = [8, 32], strides = [1, 1]} : vector<8x96xf32> to vector<8x32xf32>
    %198 = vector.extract_strided_slice %180 {offsets = [0, 64], sizes = [8, 32], strides = [1, 1]} : vector<8x96xf32> to vector<8x32xf32>
    %199 = arith.mulf %188, %198 : vector<8x32xf32>
    %200 = arith.addf %197, %199 : vector<8x32xf32>
    %201 = math.tanh %200 : vector<8x32xf32>
    %cst_55 = arith.constant 1.000000e+00 : f32
    %202 = vector.broadcast %cst_55 : f32 to vector<8x32xf32>
    %203 = arith.subf %202, %196 : vector<8x32xf32>
    %204 = arith.mulf %203, %201 : vector<8x32xf32>
    %205 = arith.mulf %196, %139 : vector<8x32xf32>
    %206 = arith.addf %204, %205 : vector<8x32xf32>
    %207 = arith.index_cast %145 : i32 to index
    %c0_56 = arith.constant 0 : index
    %208 = vector.load %arg12[%207, %c0_56] : memref<64x32xf32, #tpu.memory_space<vmem>>, vector<8x32xf32>
    tpu.vector_store %arg12[%207, %c0_56], %177 {strides = array<i32>} : memref<64x32xf32, #tpu.memory_space<vmem>>, vector<8x32xf32>,
    %209 = arith.index_cast %148 : i32 to index
    %c0_57 = arith.constant 0 : index
    %210 = vector.load %arg13[%209, %c0_57] : memref<64x32xf32, #tpu.memory_space<vmem>>, vector<8x32xf32>
    tpu.vector_store %arg13[%209, %c0_57], %206 {strides = array<i32>} : memref<64x32xf32, #tpu.memory_space<vmem>>, vector<8x32xf32>,
    %c3_i32 = arith.constant 3 : i32
    %c8_i32_58 = arith.constant 8 : i32
    %211 = arith.muli %c3_i32, %c8_i32_58 : i32
    %212 = tpu.assume_multiple %211, 8 : i32
    %c7_i32_59 = arith.constant 7 : i32
    %213 = arith.subi %c7_i32_59, %c3_i32 : i32
    %c8_i32_60 = arith.constant 8 : i32
    %214 = arith.muli %213, %c8_i32_60 : i32
    %215 = tpu.assume_multiple %214, 8 : i32
    %216 = arith.index_cast %212 : i32 to index
    %c0_61 = arith.constant 0 : index
    %217 = vector.load %arg10[%216, %c0_61] : memref<64x96xf32, #tpu.memory_space<vmem>>, vector<8x96xf32>
    %cst_62 = arith.constant dense<0.000000e+00> : vector<8x96xf32>
    %218 = tpu.matmul %177, %7, %cst_62 {dimension_numbers = #tpu.dot_dimension_numbers<[1], [0], [0], [1], [0, 0, 1, 1], [], []>} : vector<8x32xf32>, vector<32x96xf32>, vector<8x96xf32> -> vector<8x96xf32>
    %219 = vector.extract_strided_slice %217 {offsets = [0, 0], sizes = [8, 32], strides = [1, 1]} : vector<8x96xf32> to vector<8x32xf32>
    %220 = vector.extract_strided_slice %218 {offsets = [0, 0], sizes = [8, 32], strides = [1, 1]} : vector<8x96xf32> to vector<8x32xf32>
    %221 = arith.addf %219, %220 : vector<8x32xf32>
    %222 = arith.negf %221 : vector<8x32xf32>
    %223 = math.exp %222 : vector<8x32xf32>
    %cst_63 = arith.constant 1.000000e+00 : f32
    %224 = vector.broadcast %cst_63 : f32 to vector<8x32xf32>
    %225 = arith.addf %224, %223 : vector<8x32xf32>
    %226 = arith.divf %224, %225 : vector<8x32xf32>
    %227 = vector.extract_strided_slice %217 {offsets = [0, 32], sizes = [8, 32], strides = [1, 1]} : vector<8x96xf32> to vector<8x32xf32>
    %228 = vector.extract_strided_slice %218 {offsets = [0, 32], sizes = [8, 32], strides = [1, 1]} : vector<8x96xf32> to vector<8x32xf32>
    %229 = arith.addf %227, %228 : vector<8x32xf32>
    %230 = arith.negf %229 : vector<8x32xf32>
    %231 = math.exp %230 : vector<8x32xf32>
    %cst_64 = arith.constant 1.000000e+00 : f32
    %232 = vector.broadcast %cst_64 : f32 to vector<8x32xf32>
    %233 = arith.addf %232, %231 : vector<8x32xf32>
    %234 = arith.divf %232, %233 : vector<8x32xf32>
    %235 = vector.extract_strided_slice %217 {offsets = [0, 64], sizes = [8, 32], strides = [1, 1]} : vector<8x96xf32> to vector<8x32xf32>
    %236 = vector.extract_strided_slice %218 {offsets = [0, 64], sizes = [8, 32], strides = [1, 1]} : vector<8x96xf32> to vector<8x32xf32>
    %237 = arith.mulf %226, %236 : vector<8x32xf32>
    %238 = arith.addf %235, %237 : vector<8x32xf32>
    %239 = math.tanh %238 : vector<8x32xf32>
    %cst_65 = arith.constant 1.000000e+00 : f32
    %240 = vector.broadcast %cst_65 : f32 to vector<8x32xf32>
    %241 = arith.subf %240, %234 : vector<8x32xf32>
    %242 = arith.mulf %241, %239 : vector<8x32xf32>
    %243 = arith.mulf %234, %177 : vector<8x32xf32>
    %244 = arith.addf %242, %243 : vector<8x32xf32>
    %245 = arith.index_cast %215 : i32 to index
    %c0_66 = arith.constant 0 : index
    %246 = vector.load %arg11[%245, %c0_66] : memref<64x96xf32, #tpu.memory_space<vmem>>, vector<8x96xf32>
    %cst_67 = arith.constant dense<0.000000e+00> : vector<8x96xf32>
    %247 = tpu.matmul %206, %8, %cst_67 {dimension_numbers = #tpu.dot_dimension_numbers<[1], [0], [0], [1], [0, 0, 1, 1], [], []>} : vector<8x32xf32>, vector<32x96xf32>, vector<8x96xf32> -> vector<8x96xf32>
    %248 = vector.extract_strided_slice %246 {offsets = [0, 0], sizes = [8, 32], strides = [1, 1]} : vector<8x96xf32> to vector<8x32xf32>
    %249 = vector.extract_strided_slice %247 {offsets = [0, 0], sizes = [8, 32], strides = [1, 1]} : vector<8x96xf32> to vector<8x32xf32>
    %250 = arith.addf %248, %249 : vector<8x32xf32>
    %251 = arith.negf %250 : vector<8x32xf32>
    %252 = math.exp %251 : vector<8x32xf32>
    %cst_68 = arith.constant 1.000000e+00 : f32
    %253 = vector.broadcast %cst_68 : f32 to vector<8x32xf32>
    %254 = arith.addf %253, %252 : vector<8x32xf32>
    %255 = arith.divf %253, %254 : vector<8x32xf32>
    %256 = vector.extract_strided_slice %246 {offsets = [0, 32], sizes = [8, 32], strides = [1, 1]} : vector<8x96xf32> to vector<8x32xf32>
    %257 = vector.extract_strided_slice %247 {offsets = [0, 32], sizes = [8, 32], strides = [1, 1]} : vector<8x96xf32> to vector<8x32xf32>
    %258 = arith.addf %256, %257 : vector<8x32xf32>
    %259 = arith.negf %258 : vector<8x32xf32>
    %260 = math.exp %259 : vector<8x32xf32>
    %cst_69 = arith.constant 1.000000e+00 : f32
    %261 = vector.broadcast %cst_69 : f32 to vector<8x32xf32>
    %262 = arith.addf %261, %260 : vector<8x32xf32>
    %263 = arith.divf %261, %262 : vector<8x32xf32>
    %264 = vector.extract_strided_slice %246 {offsets = [0, 64], sizes = [8, 32], strides = [1, 1]} : vector<8x96xf32> to vector<8x32xf32>
    %265 = vector.extract_strided_slice %247 {offsets = [0, 64], sizes = [8, 32], strides = [1, 1]} : vector<8x96xf32> to vector<8x32xf32>
    %266 = arith.mulf %255, %265 : vector<8x32xf32>
    %267 = arith.addf %264, %266 : vector<8x32xf32>
    %268 = math.tanh %267 : vector<8x32xf32>
    %cst_70 = arith.constant 1.000000e+00 : f32
    %269 = vector.broadcast %cst_70 : f32 to vector<8x32xf32>
    %270 = arith.subf %269, %263 : vector<8x32xf32>
    %271 = arith.mulf %270, %268 : vector<8x32xf32>
    %272 = arith.mulf %263, %206 : vector<8x32xf32>
    %273 = arith.addf %271, %272 : vector<8x32xf32>
    %274 = arith.index_cast %212 : i32 to index
    %c0_71 = arith.constant 0 : index
    %275 = vector.load %arg12[%274, %c0_71] : memref<64x32xf32, #tpu.memory_space<vmem>>, vector<8x32xf32>
    tpu.vector_store %arg12[%274, %c0_71], %244 {strides = array<i32>} : memref<64x32xf32, #tpu.memory_space<vmem>>, vector<8x32xf32>,
    %276 = arith.index_cast %215 : i32 to index
    %c0_72 = arith.constant 0 : index
    %277 = vector.load %arg13[%276, %c0_72] : memref<64x32xf32, #tpu.memory_space<vmem>>, vector<8x32xf32>
    tpu.vector_store %arg13[%276, %c0_72], %273 {strides = array<i32>} : memref<64x32xf32, #tpu.memory_space<vmem>>, vector<8x32xf32>,
    %c4_i32 = arith.constant 4 : i32
    %c8_i32_73 = arith.constant 8 : i32
    %278 = arith.muli %c4_i32, %c8_i32_73 : i32
    %279 = tpu.assume_multiple %278, 8 : i32
    %c7_i32_74 = arith.constant 7 : i32
    %280 = arith.subi %c7_i32_74, %c4_i32 : i32
    %c8_i32_75 = arith.constant 8 : i32
    %281 = arith.muli %280, %c8_i32_75 : i32
    %282 = tpu.assume_multiple %281, 8 : i32
    %283 = arith.index_cast %279 : i32 to index
    %c0_76 = arith.constant 0 : index
    %284 = vector.load %arg10[%283, %c0_76] : memref<64x96xf32, #tpu.memory_space<vmem>>, vector<8x96xf32>
    %cst_77 = arith.constant dense<0.000000e+00> : vector<8x96xf32>
    %285 = tpu.matmul %244, %7, %cst_77 {dimension_numbers = #tpu.dot_dimension_numbers<[1], [0], [0], [1], [0, 0, 1, 1], [], []>} : vector<8x32xf32>, vector<32x96xf32>, vector<8x96xf32> -> vector<8x96xf32>
    %286 = vector.extract_strided_slice %284 {offsets = [0, 0], sizes = [8, 32], strides = [1, 1]} : vector<8x96xf32> to vector<8x32xf32>
    %287 = vector.extract_strided_slice %285 {offsets = [0, 0], sizes = [8, 32], strides = [1, 1]} : vector<8x96xf32> to vector<8x32xf32>
    %288 = arith.addf %286, %287 : vector<8x32xf32>
    %289 = arith.negf %288 : vector<8x32xf32>
    %290 = math.exp %289 : vector<8x32xf32>
    %cst_78 = arith.constant 1.000000e+00 : f32
    %291 = vector.broadcast %cst_78 : f32 to vector<8x32xf32>
    %292 = arith.addf %291, %290 : vector<8x32xf32>
    %293 = arith.divf %291, %292 : vector<8x32xf32>
    %294 = vector.extract_strided_slice %284 {offsets = [0, 32], sizes = [8, 32], strides = [1, 1]} : vector<8x96xf32> to vector<8x32xf32>
    %295 = vector.extract_strided_slice %285 {offsets = [0, 32], sizes = [8, 32], strides = [1, 1]} : vector<8x96xf32> to vector<8x32xf32>
    %296 = arith.addf %294, %295 : vector<8x32xf32>
    %297 = arith.negf %296 : vector<8x32xf32>
    %298 = math.exp %297 : vector<8x32xf32>
    %cst_79 = arith.constant 1.000000e+00 : f32
    %299 = vector.broadcast %cst_79 : f32 to vector<8x32xf32>
    %300 = arith.addf %299, %298 : vector<8x32xf32>
    %301 = arith.divf %299, %300 : vector<8x32xf32>
    %302 = vector.extract_strided_slice %284 {offsets = [0, 64], sizes = [8, 32], strides = [1, 1]} : vector<8x96xf32> to vector<8x32xf32>
    %303 = vector.extract_strided_slice %285 {offsets = [0, 64], sizes = [8, 32], strides = [1, 1]} : vector<8x96xf32> to vector<8x32xf32>
    %304 = arith.mulf %293, %303 : vector<8x32xf32>
    %305 = arith.addf %302, %304 : vector<8x32xf32>
    %306 = math.tanh %305 : vector<8x32xf32>
    %cst_80 = arith.constant 1.000000e+00 : f32
    %307 = vector.broadcast %cst_80 : f32 to vector<8x32xf32>
    %308 = arith.subf %307, %301 : vector<8x32xf32>
    %309 = arith.mulf %308, %306 : vector<8x32xf32>
    %310 = arith.mulf %301, %244 : vector<8x32xf32>
    %311 = arith.addf %309, %310 : vector<8x32xf32>
    %312 = arith.index_cast %282 : i32 to index
    %c0_81 = arith.constant 0 : index
    %313 = vector.load %arg11[%312, %c0_81] : memref<64x96xf32, #tpu.memory_space<vmem>>, vector<8x96xf32>
    %cst_82 = arith.constant dense<0.000000e+00> : vector<8x96xf32>
    %314 = tpu.matmul %273, %8, %cst_82 {dimension_numbers = #tpu.dot_dimension_numbers<[1], [0], [0], [1], [0, 0, 1, 1], [], []>} : vector<8x32xf32>, vector<32x96xf32>, vector<8x96xf32> -> vector<8x96xf32>
    %315 = vector.extract_strided_slice %313 {offsets = [0, 0], sizes = [8, 32], strides = [1, 1]} : vector<8x96xf32> to vector<8x32xf32>
    %316 = vector.extract_strided_slice %314 {offsets = [0, 0], sizes = [8, 32], strides = [1, 1]} : vector<8x96xf32> to vector<8x32xf32>
    %317 = arith.addf %315, %316 : vector<8x32xf32>
    %318 = arith.negf %317 : vector<8x32xf32>
    %319 = math.exp %318 : vector<8x32xf32>
    %cst_83 = arith.constant 1.000000e+00 : f32
    %320 = vector.broadcast %cst_83 : f32 to vector<8x32xf32>
    %321 = arith.addf %320, %319 : vector<8x32xf32>
    %322 = arith.divf %320, %321 : vector<8x32xf32>
    %323 = vector.extract_strided_slice %313 {offsets = [0, 32], sizes = [8, 32], strides = [1, 1]} : vector<8x96xf32> to vector<8x32xf32>
    %324 = vector.extract_strided_slice %314 {offsets = [0, 32], sizes = [8, 32], strides = [1, 1]} : vector<8x96xf32> to vector<8x32xf32>
    %325 = arith.addf %323, %324 : vector<8x32xf32>
    %326 = arith.negf %325 : vector<8x32xf32>
    %327 = math.exp %326 : vector<8x32xf32>
    %cst_84 = arith.constant 1.000000e+00 : f32
    %328 = vector.broadcast %cst_84 : f32 to vector<8x32xf32>
    %329 = arith.addf %328, %327 : vector<8x32xf32>
    %330 = arith.divf %328, %329 : vector<8x32xf32>
    %331 = vector.extract_strided_slice %313 {offsets = [0, 64], sizes = [8, 32], strides = [1, 1]} : vector<8x96xf32> to vector<8x32xf32>
    %332 = vector.extract_strided_slice %314 {offsets = [0, 64], sizes = [8, 32], strides = [1, 1]} : vector<8x96xf32> to vector<8x32xf32>
    %333 = arith.mulf %322, %332 : vector<8x32xf32>
    %334 = arith.addf %331, %333 : vector<8x32xf32>
    %335 = math.tanh %334 : vector<8x32xf32>
    %cst_85 = arith.constant 1.000000e+00 : f32
    %336 = vector.broadcast %cst_85 : f32 to vector<8x32xf32>
    %337 = arith.subf %336, %330 : vector<8x32xf32>
    %338 = arith.mulf %337, %335 : vector<8x32xf32>
    %339 = arith.mulf %330, %273 : vector<8x32xf32>
    %340 = arith.addf %338, %339 : vector<8x32xf32>
    %341 = arith.index_cast %279 : i32 to index
    %c0_86 = arith.constant 0 : index
    %342 = vector.load %arg12[%341, %c0_86] : memref<64x32xf32, #tpu.memory_space<vmem>>, vector<8x32xf32>
    tpu.vector_store %arg12[%341, %c0_86], %311 {strides = array<i32>} : memref<64x32xf32, #tpu.memory_space<vmem>>, vector<8x32xf32>,
    %343 = arith.index_cast %282 : i32 to index
    %c0_87 = arith.constant 0 : index
    %344 = vector.load %arg13[%343, %c0_87] : memref<64x32xf32, #tpu.memory_space<vmem>>, vector<8x32xf32>
    tpu.vector_store %arg13[%343, %c0_87], %340 {strides = array<i32>} : memref<64x32xf32, #tpu.memory_space<vmem>>, vector<8x32xf32>,
    %c5_i32 = arith.constant 5 : i32
    %c8_i32_88 = arith.constant 8 : i32
    %345 = arith.muli %c5_i32, %c8_i32_88 : i32
    %346 = tpu.assume_multiple %345, 8 : i32
    %c7_i32_89 = arith.constant 7 : i32
    %347 = arith.subi %c7_i32_89, %c5_i32 : i32
    %c8_i32_90 = arith.constant 8 : i32
    %348 = arith.muli %347, %c8_i32_90 : i32
    %349 = tpu.assume_multiple %348, 8 : i32
    %350 = arith.index_cast %346 : i32 to index
    %c0_91 = arith.constant 0 : index
    %351 = vector.load %arg10[%350, %c0_91] : memref<64x96xf32, #tpu.memory_space<vmem>>, vector<8x96xf32>
    %cst_92 = arith.constant dense<0.000000e+00> : vector<8x96xf32>
    %352 = tpu.matmul %311, %7, %cst_92 {dimension_numbers = #tpu.dot_dimension_numbers<[1], [0], [0], [1], [0, 0, 1, 1], [], []>} : vector<8x32xf32>, vector<32x96xf32>, vector<8x96xf32> -> vector<8x96xf32>
    %353 = vector.extract_strided_slice %351 {offsets = [0, 0], sizes = [8, 32], strides = [1, 1]} : vector<8x96xf32> to vector<8x32xf32>
    %354 = vector.extract_strided_slice %352 {offsets = [0, 0], sizes = [8, 32], strides = [1, 1]} : vector<8x96xf32> to vector<8x32xf32>
    %355 = arith.addf %353, %354 : vector<8x32xf32>
    %356 = arith.negf %355 : vector<8x32xf32>
    %357 = math.exp %356 : vector<8x32xf32>
    %cst_93 = arith.constant 1.000000e+00 : f32
    %358 = vector.broadcast %cst_93 : f32 to vector<8x32xf32>
    %359 = arith.addf %358, %357 : vector<8x32xf32>
    %360 = arith.divf %358, %359 : vector<8x32xf32>
    %361 = vector.extract_strided_slice %351 {offsets = [0, 32], sizes = [8, 32], strides = [1, 1]} : vector<8x96xf32> to vector<8x32xf32>
    %362 = vector.extract_strided_slice %352 {offsets = [0, 32], sizes = [8, 32], strides = [1, 1]} : vector<8x96xf32> to vector<8x32xf32>
    %363 = arith.addf %361, %362 : vector<8x32xf32>
    %364 = arith.negf %363 : vector<8x32xf32>
    %365 = math.exp %364 : vector<8x32xf32>
    %cst_94 = arith.constant 1.000000e+00 : f32
    %366 = vector.broadcast %cst_94 : f32 to vector<8x32xf32>
    %367 = arith.addf %366, %365 : vector<8x32xf32>
    %368 = arith.divf %366, %367 : vector<8x32xf32>
    %369 = vector.extract_strided_slice %351 {offsets = [0, 64], sizes = [8, 32], strides = [1, 1]} : vector<8x96xf32> to vector<8x32xf32>
    %370 = vector.extract_strided_slice %352 {offsets = [0, 64], sizes = [8, 32], strides = [1, 1]} : vector<8x96xf32> to vector<8x32xf32>
    %371 = arith.mulf %360, %370 : vector<8x32xf32>
    %372 = arith.addf %369, %371 : vector<8x32xf32>
    %373 = math.tanh %372 : vector<8x32xf32>
    %cst_95 = arith.constant 1.000000e+00 : f32
    %374 = vector.broadcast %cst_95 : f32 to vector<8x32xf32>
    %375 = arith.subf %374, %368 : vector<8x32xf32>
    %376 = arith.mulf %375, %373 : vector<8x32xf32>
    %377 = arith.mulf %368, %311 : vector<8x32xf32>
    %378 = arith.addf %376, %377 : vector<8x32xf32>
    %379 = arith.index_cast %349 : i32 to index
    %c0_96 = arith.constant 0 : index
    %380 = vector.load %arg11[%379, %c0_96] : memref<64x96xf32, #tpu.memory_space<vmem>>, vector<8x96xf32>
    %cst_97 = arith.constant dense<0.000000e+00> : vector<8x96xf32>
    %381 = tpu.matmul %340, %8, %cst_97 {dimension_numbers = #tpu.dot_dimension_numbers<[1], [0], [0], [1], [0, 0, 1, 1], [], []>} : vector<8x32xf32>, vector<32x96xf32>, vector<8x96xf32> -> vector<8x96xf32>
    %382 = vector.extract_strided_slice %380 {offsets = [0, 0], sizes = [8, 32], strides = [1, 1]} : vector<8x96xf32> to vector<8x32xf32>
    %383 = vector.extract_strided_slice %381 {offsets = [0, 0], sizes = [8, 32], strides = [1, 1]} : vector<8x96xf32> to vector<8x32xf32>
    %384 = arith.addf %382, %383 : vector<8x32xf32>
    %385 = arith.negf %384 : vector<8x32xf32>
    %386 = math.exp %385 : vector<8x32xf32>
    %cst_98 = arith.constant 1.000000e+00 : f32
    %387 = vector.broadcast %cst_98 : f32 to vector<8x32xf32>
    %388 = arith.addf %387, %386 : vector<8x32xf32>
    %389 = arith.divf %387, %388 : vector<8x32xf32>
    %390 = vector.extract_strided_slice %380 {offsets = [0, 32], sizes = [8, 32], strides = [1, 1]} : vector<8x96xf32> to vector<8x32xf32>
    %391 = vector.extract_strided_slice %381 {offsets = [0, 32], sizes = [8, 32], strides = [1, 1]} : vector<8x96xf32> to vector<8x32xf32>
    %392 = arith.addf %390, %391 : vector<8x32xf32>
    %393 = arith.negf %392 : vector<8x32xf32>
    %394 = math.exp %393 : vector<8x32xf32>
    %cst_99 = arith.constant 1.000000e+00 : f32
    %395 = vector.broadcast %cst_99 : f32 to vector<8x32xf32>
    %396 = arith.addf %395, %394 : vector<8x32xf32>
    %397 = arith.divf %395, %396 : vector<8x32xf32>
    %398 = vector.extract_strided_slice %380 {offsets = [0, 64], sizes = [8, 32], strides = [1, 1]} : vector<8x96xf32> to vector<8x32xf32>
    %399 = vector.extract_strided_slice %381 {offsets = [0, 64], sizes = [8, 32], strides = [1, 1]} : vector<8x96xf32> to vector<8x32xf32>
    %400 = arith.mulf %389, %399 : vector<8x32xf32>
    %401 = arith.addf %398, %400 : vector<8x32xf32>
    %402 = math.tanh %401 : vector<8x32xf32>
    %cst_100 = arith.constant 1.000000e+00 : f32
    %403 = vector.broadcast %cst_100 : f32 to vector<8x32xf32>
    %404 = arith.subf %403, %397 : vector<8x32xf32>
    %405 = arith.mulf %404, %402 : vector<8x32xf32>
    %406 = arith.mulf %397, %340 : vector<8x32xf32>
    %407 = arith.addf %405, %406 : vector<8x32xf32>
    %408 = arith.index_cast %346 : i32 to index
    %c0_101 = arith.constant 0 : index
    %409 = vector.load %arg12[%408, %c0_101] : memref<64x32xf32, #tpu.memory_space<vmem>>, vector<8x32xf32>
    tpu.vector_store %arg12[%408, %c0_101], %378 {strides = array<i32>} : memref<64x32xf32, #tpu.memory_space<vmem>>, vector<8x32xf32>,
    %410 = arith.index_cast %349 : i32 to index
    %c0_102 = arith.constant 0 : index
    %411 = vector.load %arg13[%410, %c0_102] : memref<64x32xf32, #tpu.memory_space<vmem>>, vector<8x32xf32>
    tpu.vector_store %arg13[%410, %c0_102], %407 {strides = array<i32>} : memref<64x32xf32, #tpu.memory_space<vmem>>, vector<8x32xf32>,
    %c6_i32 = arith.constant 6 : i32
    %c8_i32_103 = arith.constant 8 : i32
    %412 = arith.muli %c6_i32, %c8_i32_103 : i32
    %413 = tpu.assume_multiple %412, 8 : i32
    %c7_i32_104 = arith.constant 7 : i32
    %414 = arith.subi %c7_i32_104, %c6_i32 : i32
    %c8_i32_105 = arith.constant 8 : i32
    %415 = arith.muli %414, %c8_i32_105 : i32
    %416 = tpu.assume_multiple %415, 8 : i32
    %417 = arith.index_cast %413 : i32 to index
    %c0_106 = arith.constant 0 : index
    %418 = vector.load %arg10[%417, %c0_106] : memref<64x96xf32, #tpu.memory_space<vmem>>, vector<8x96xf32>
    %cst_107 = arith.constant dense<0.000000e+00> : vector<8x96xf32>
    %419 = tpu.matmul %378, %7, %cst_107 {dimension_numbers = #tpu.dot_dimension_numbers<[1], [0], [0], [1], [0, 0, 1, 1], [], []>} : vector<8x32xf32>, vector<32x96xf32>, vector<8x96xf32> -> vector<8x96xf32>
    %420 = vector.extract_strided_slice %418 {offsets = [0, 0], sizes = [8, 32], strides = [1, 1]} : vector<8x96xf32> to vector<8x32xf32>
    %421 = vector.extract_strided_slice %419 {offsets = [0, 0], sizes = [8, 32], strides = [1, 1]} : vector<8x96xf32> to vector<8x32xf32>
    %422 = arith.addf %420, %421 : vector<8x32xf32>
    %423 = arith.negf %422 : vector<8x32xf32>
    %424 = math.exp %423 : vector<8x32xf32>
    %cst_108 = arith.constant 1.000000e+00 : f32
    %425 = vector.broadcast %cst_108 : f32 to vector<8x32xf32>
    %426 = arith.addf %425, %424 : vector<8x32xf32>
    %427 = arith.divf %425, %426 : vector<8x32xf32>
    %428 = vector.extract_strided_slice %418 {offsets = [0, 32], sizes = [8, 32], strides = [1, 1]} : vector<8x96xf32> to vector<8x32xf32>
    %429 = vector.extract_strided_slice %419 {offsets = [0, 32], sizes = [8, 32], strides = [1, 1]} : vector<8x96xf32> to vector<8x32xf32>
    %430 = arith.addf %428, %429 : vector<8x32xf32>
    %431 = arith.negf %430 : vector<8x32xf32>
    %432 = math.exp %431 : vector<8x32xf32>
    %cst_109 = arith.constant 1.000000e+00 : f32
    %433 = vector.broadcast %cst_109 : f32 to vector<8x32xf32>
    %434 = arith.addf %433, %432 : vector<8x32xf32>
    %435 = arith.divf %433, %434 : vector<8x32xf32>
    %436 = vector.extract_strided_slice %418 {offsets = [0, 64], sizes = [8, 32], strides = [1, 1]} : vector<8x96xf32> to vector<8x32xf32>
    %437 = vector.extract_strided_slice %419 {offsets = [0, 64], sizes = [8, 32], strides = [1, 1]} : vector<8x96xf32> to vector<8x32xf32>
    %438 = arith.mulf %427, %437 : vector<8x32xf32>
    %439 = arith.addf %436, %438 : vector<8x32xf32>
    %440 = math.tanh %439 : vector<8x32xf32>
    %cst_110 = arith.constant 1.000000e+00 : f32
    %441 = vector.broadcast %cst_110 : f32 to vector<8x32xf32>
    %442 = arith.subf %441, %435 : vector<8x32xf32>
    %443 = arith.mulf %442, %440 : vector<8x32xf32>
    %444 = arith.mulf %435, %378 : vector<8x32xf32>
    %445 = arith.addf %443, %444 : vector<8x32xf32>
    %446 = arith.index_cast %416 : i32 to index
    %c0_111 = arith.constant 0 : index
    %447 = vector.load %arg11[%446, %c0_111] : memref<64x96xf32, #tpu.memory_space<vmem>>, vector<8x96xf32>
    %cst_112 = arith.constant dense<0.000000e+00> : vector<8x96xf32>
    %448 = tpu.matmul %407, %8, %cst_112 {dimension_numbers = #tpu.dot_dimension_numbers<[1], [0], [0], [1], [0, 0, 1, 1], [], []>} : vector<8x32xf32>, vector<32x96xf32>, vector<8x96xf32> -> vector<8x96xf32>
    %449 = vector.extract_strided_slice %447 {offsets = [0, 0], sizes = [8, 32], strides = [1, 1]} : vector<8x96xf32> to vector<8x32xf32>
    %450 = vector.extract_strided_slice %448 {offsets = [0, 0], sizes = [8, 32], strides = [1, 1]} : vector<8x96xf32> to vector<8x32xf32>
    %451 = arith.addf %449, %450 : vector<8x32xf32>
    %452 = arith.negf %451 : vector<8x32xf32>
    %453 = math.exp %452 : vector<8x32xf32>
    %cst_113 = arith.constant 1.000000e+00 : f32
    %454 = vector.broadcast %cst_113 : f32 to vector<8x32xf32>
    %455 = arith.addf %454, %453 : vector<8x32xf32>
    %456 = arith.divf %454, %455 : vector<8x32xf32>
    %457 = vector.extract_strided_slice %447 {offsets = [0, 32], sizes = [8, 32], strides = [1, 1]} : vector<8x96xf32> to vector<8x32xf32>
    %458 = vector.extract_strided_slice %448 {offsets = [0, 32], sizes = [8, 32], strides = [1, 1]} : vector<8x96xf32> to vector<8x32xf32>
    %459 = arith.addf %457, %458 : vector<8x32xf32>
    %460 = arith.negf %459 : vector<8x32xf32>
    %461 = math.exp %460 : vector<8x32xf32>
    %cst_114 = arith.constant 1.000000e+00 : f32
    %462 = vector.broadcast %cst_114 : f32 to vector<8x32xf32>
    %463 = arith.addf %462, %461 : vector<8x32xf32>
    %464 = arith.divf %462, %463 : vector<8x32xf32>
    %465 = vector.extract_strided_slice %447 {offsets = [0, 64], sizes = [8, 32], strides = [1, 1]} : vector<8x96xf32> to vector<8x32xf32>
    %466 = vector.extract_strided_slice %448 {offsets = [0, 64], sizes = [8, 32], strides = [1, 1]} : vector<8x96xf32> to vector<8x32xf32>
    %467 = arith.mulf %456, %466 : vector<8x32xf32>
    %468 = arith.addf %465, %467 : vector<8x32xf32>
    %469 = math.tanh %468 : vector<8x32xf32>
    %cst_115 = arith.constant 1.000000e+00 : f32
    %470 = vector.broadcast %cst_115 : f32 to vector<8x32xf32>
    %471 = arith.subf %470, %464 : vector<8x32xf32>
    %472 = arith.mulf %471, %469 : vector<8x32xf32>
    %473 = arith.mulf %464, %407 : vector<8x32xf32>
    %474 = arith.addf %472, %473 : vector<8x32xf32>
    %475 = arith.index_cast %413 : i32 to index
    %c0_116 = arith.constant 0 : index
    %476 = vector.load %arg12[%475, %c0_116] : memref<64x32xf32, #tpu.memory_space<vmem>>, vector<8x32xf32>
    tpu.vector_store %arg12[%475, %c0_116], %445 {strides = array<i32>} : memref<64x32xf32, #tpu.memory_space<vmem>>, vector<8x32xf32>,
    %477 = arith.index_cast %416 : i32 to index
    %c0_117 = arith.constant 0 : index
    %478 = vector.load %arg13[%477, %c0_117] : memref<64x32xf32, #tpu.memory_space<vmem>>, vector<8x32xf32>
    tpu.vector_store %arg13[%477, %c0_117], %474 {strides = array<i32>} : memref<64x32xf32, #tpu.memory_space<vmem>>, vector<8x32xf32>,
    %c7_i32_118 = arith.constant 7 : i32
    %c8_i32_119 = arith.constant 8 : i32
    %479 = arith.muli %c7_i32_118, %c8_i32_119 : i32
    %480 = tpu.assume_multiple %479, 8 : i32
    %c7_i32_120 = arith.constant 7 : i32
    %481 = arith.subi %c7_i32_120, %c7_i32_118 : i32
    %c8_i32_121 = arith.constant 8 : i32
    %482 = arith.muli %481, %c8_i32_121 : i32
    %483 = tpu.assume_multiple %482, 8 : i32
    %484 = arith.index_cast %480 : i32 to index
    %c0_122 = arith.constant 0 : index
    %485 = vector.load %arg10[%484, %c0_122] : memref<64x96xf32, #tpu.memory_space<vmem>>, vector<8x96xf32>
    %cst_123 = arith.constant dense<0.000000e+00> : vector<8x96xf32>
    %486 = tpu.matmul %445, %7, %cst_123 {dimension_numbers = #tpu.dot_dimension_numbers<[1], [0], [0], [1], [0, 0, 1, 1], [], []>} : vector<8x32xf32>, vector<32x96xf32>, vector<8x96xf32> -> vector<8x96xf32>
    %487 = vector.extract_strided_slice %485 {offsets = [0, 0], sizes = [8, 32], strides = [1, 1]} : vector<8x96xf32> to vector<8x32xf32>
    %488 = vector.extract_strided_slice %486 {offsets = [0, 0], sizes = [8, 32], strides = [1, 1]} : vector<8x96xf32> to vector<8x32xf32>
    %489 = arith.addf %487, %488 : vector<8x32xf32>
    %490 = arith.negf %489 : vector<8x32xf32>
    %491 = math.exp %490 : vector<8x32xf32>
    %cst_124 = arith.constant 1.000000e+00 : f32
    %492 = vector.broadcast %cst_124 : f32 to vector<8x32xf32>
    %493 = arith.addf %492, %491 : vector<8x32xf32>
    %494 = arith.divf %492, %493 : vector<8x32xf32>
    %495 = vector.extract_strided_slice %485 {offsets = [0, 32], sizes = [8, 32], strides = [1, 1]} : vector<8x96xf32> to vector<8x32xf32>
    %496 = vector.extract_strided_slice %486 {offsets = [0, 32], sizes = [8, 32], strides = [1, 1]} : vector<8x96xf32> to vector<8x32xf32>
    %497 = arith.addf %495, %496 : vector<8x32xf32>
    %498 = arith.negf %497 : vector<8x32xf32>
    %499 = math.exp %498 : vector<8x32xf32>
    %cst_125 = arith.constant 1.000000e+00 : f32
    %500 = vector.broadcast %cst_125 : f32 to vector<8x32xf32>
    %501 = arith.addf %500, %499 : vector<8x32xf32>
    %502 = arith.divf %500, %501 : vector<8x32xf32>
    %503 = vector.extract_strided_slice %485 {offsets = [0, 64], sizes = [8, 32], strides = [1, 1]} : vector<8x96xf32> to vector<8x32xf32>
    %504 = vector.extract_strided_slice %486 {offsets = [0, 64], sizes = [8, 32], strides = [1, 1]} : vector<8x96xf32> to vector<8x32xf32>
    %505 = arith.mulf %494, %504 : vector<8x32xf32>
    %506 = arith.addf %503, %505 : vector<8x32xf32>
    %507 = math.tanh %506 : vector<8x32xf32>
    %cst_126 = arith.constant 1.000000e+00 : f32
    %508 = vector.broadcast %cst_126 : f32 to vector<8x32xf32>
    %509 = arith.subf %508, %502 : vector<8x32xf32>
    %510 = arith.mulf %509, %507 : vector<8x32xf32>
    %511 = arith.mulf %502, %445 : vector<8x32xf32>
    %512 = arith.addf %510, %511 : vector<8x32xf32>
    %513 = arith.index_cast %483 : i32 to index
    %c0_127 = arith.constant 0 : index
    %514 = vector.load %arg11[%513, %c0_127] : memref<64x96xf32, #tpu.memory_space<vmem>>, vector<8x96xf32>
    %cst_128 = arith.constant dense<0.000000e+00> : vector<8x96xf32>
    %515 = tpu.matmul %474, %8, %cst_128 {dimension_numbers = #tpu.dot_dimension_numbers<[1], [0], [0], [1], [0, 0, 1, 1], [], []>} : vector<8x32xf32>, vector<32x96xf32>, vector<8x96xf32> -> vector<8x96xf32>
    %516 = vector.extract_strided_slice %514 {offsets = [0, 0], sizes = [8, 32], strides = [1, 1]} : vector<8x96xf32> to vector<8x32xf32>
    %517 = vector.extract_strided_slice %515 {offsets = [0, 0], sizes = [8, 32], strides = [1, 1]} : vector<8x96xf32> to vector<8x32xf32>
    %518 = arith.addf %516, %517 : vector<8x32xf32>
    %519 = arith.negf %518 : vector<8x32xf32>
    %520 = math.exp %519 : vector<8x32xf32>
    %cst_129 = arith.constant 1.000000e+00 : f32
    %521 = vector.broadcast %cst_129 : f32 to vector<8x32xf32>
    %522 = arith.addf %521, %520 : vector<8x32xf32>
    %523 = arith.divf %521, %522 : vector<8x32xf32>
    %524 = vector.extract_strided_slice %514 {offsets = [0, 32], sizes = [8, 32], strides = [1, 1]} : vector<8x96xf32> to vector<8x32xf32>
    %525 = vector.extract_strided_slice %515 {offsets = [0, 32], sizes = [8, 32], strides = [1, 1]} : vector<8x96xf32> to vector<8x32xf32>
    %526 = arith.addf %524, %525 : vector<8x32xf32>
    %527 = arith.negf %526 : vector<8x32xf32>
    %528 = math.exp %527 : vector<8x32xf32>
    %cst_130 = arith.constant 1.000000e+00 : f32
    %529 = vector.broadcast %cst_130 : f32 to vector<8x32xf32>
    %530 = arith.addf %529, %528 : vector<8x32xf32>
    %531 = arith.divf %529, %530 : vector<8x32xf32>
    %532 = vector.extract_strided_slice %514 {offsets = [0, 64], sizes = [8, 32], strides = [1, 1]} : vector<8x96xf32> to vector<8x32xf32>
    %533 = vector.extract_strided_slice %515 {offsets = [0, 64], sizes = [8, 32], strides = [1, 1]} : vector<8x96xf32> to vector<8x32xf32>
    %534 = arith.mulf %523, %533 : vector<8x32xf32>
    %535 = arith.addf %532, %534 : vector<8x32xf32>
    %536 = math.tanh %535 : vector<8x32xf32>
    %cst_131 = arith.constant 1.000000e+00 : f32
    %537 = vector.broadcast %cst_131 : f32 to vector<8x32xf32>
    %538 = arith.subf %537, %531 : vector<8x32xf32>
    %539 = arith.mulf %538, %536 : vector<8x32xf32>
    %540 = arith.mulf %531, %474 : vector<8x32xf32>
    %541 = arith.addf %539, %540 : vector<8x32xf32>
    %542 = arith.index_cast %480 : i32 to index
    %c0_132 = arith.constant 0 : index
    %543 = vector.load %arg12[%542, %c0_132] : memref<64x32xf32, #tpu.memory_space<vmem>>, vector<8x32xf32>
    tpu.vector_store %arg12[%542, %c0_132], %512 {strides = array<i32>} : memref<64x32xf32, #tpu.memory_space<vmem>>, vector<8x32xf32>,
    %544 = arith.index_cast %483 : i32 to index
    %c0_133 = arith.constant 0 : index
    %545 = vector.load %arg13[%544, %c0_133] : memref<64x32xf32, #tpu.memory_space<vmem>>, vector<8x32xf32>
    tpu.vector_store %arg13[%544, %c0_133], %541 {strides = array<i32>} : memref<64x32xf32, #tpu.memory_space<vmem>>, vector<8x32xf32>,
    %c8_i32_134 = arith.constant 8 : i32
    %c0_135 = arith.constant 0 : index
    %c0_136 = arith.constant 0 : index
    %546 = vector.load %arg12[%c0_135, %c0_136] : memref<64x32xf32, #tpu.memory_space<vmem>>, vector<64x32xf32>
    %c0_137 = arith.constant 0 : index
    %c0_138 = arith.constant 0 : index
    %547 = vector.load %arg6[%c0_137, %c0_138] : memref<32x128xf32, #tpu.memory_space<vmem>>, vector<32x128xf32>
    %cst_139 = arith.constant dense<0.000000e+00> : vector<64x128xf32>
    %548 = tpu.matmul %546, %547, %cst_139 {dimension_numbers = #tpu.dot_dimension_numbers<[1], [0], [0], [1], [0, 0, 1, 1], [], []>} : vector<64x32xf32>, vector<32x128xf32>, vector<64x128xf32> -> vector<64x128xf32>
    %c0_140 = arith.constant 0 : index
    %c0_141 = arith.constant 0 : index
    %549 = vector.load %arg13[%c0_140, %c0_141] : memref<64x32xf32, #tpu.memory_space<vmem>>, vector<64x32xf32>
    %c0_142 = arith.constant 0 : index
    %c0_143 = arith.constant 0 : index
    %550 = vector.load %arg7[%c0_142, %c0_143] : memref<32x128xf32, #tpu.memory_space<vmem>>, vector<32x128xf32>
    %cst_144 = arith.constant dense<0.000000e+00> : vector<64x128xf32>
    %551 = tpu.matmul %549, %550, %cst_144 {dimension_numbers = #tpu.dot_dimension_numbers<[1], [0], [0], [1], [0, 0, 1, 1], [], []>} : vector<64x32xf32>, vector<32x128xf32>, vector<64x128xf32> -> vector<64x128xf32>
    %552 = arith.addf %548, %551 : vector<64x128xf32>
    %c0_145 = arith.constant 0 : index
    %c0_146 = arith.constant 0 : index
    %553 = vector.load %arg8[%c0_145, %c0_146] : memref<1x128xf32, #tpu.memory_space<vmem>>, vector<1x128xf32>
    %554 = vector.broadcast %553 : vector<1x128xf32> to vector<64x128xf32>
    %555 = arith.addf %552, %554 : vector<64x128xf32>
    %c0_147 = arith.constant 0 : index
    %c0_148 = arith.constant 0 : index
    %556 = vector.load %arg9[%c0_147, %c0_148] : memref<64x128xf32, #tpu.memory_space<vmem>>, vector<64x128xf32>
    tpu.vector_store %arg9[%c0_147, %c0_148], %555 {strides = array<i32>} : memref<64x128xf32, #tpu.memory_space<vmem>>, vector<64x128xf32>,
    return
  }
  func.func @transform_0(%arg0: i32) -> (i32, i32) {
    %c0_i32 = arith.constant 0 : i32
    %c0_i32_0 = arith.constant 0 : i32
    %c0_i32_1 = arith.constant 0 : i32
    return %c0_i32, %c0_i32_0 : i32, i32
  }
  func.func @transform_1(%arg0: i32) -> (i32, i32) {
    %c0_i32 = arith.constant 0 : i32
    %c0_i32_0 = arith.constant 0 : i32
    %c0_i32_1 = arith.constant 0 : i32
    return %c0_i32, %c0_i32_0 : i32, i32
  }
  func.func @transform_2(%arg0: i32) -> (i32, i32) {
    %c0_i32 = arith.constant 0 : i32
    %c0_i32_0 = arith.constant 0 : i32
    %c0_i32_1 = arith.constant 0 : i32
    return %c0_i32, %c0_i32_0 : i32, i32
  }
  func.func @transform_3(%arg0: i32) -> (i32, i32) {
    %c0_i32 = arith.constant 0 : i32
    %c0_i32_0 = arith.constant 0 : i32
    %c0_i32_1 = arith.constant 0 : i32
    return %c0_i32, %c0_i32_0 : i32, i32
  }
  func.func @transform_4(%arg0: i32) -> (i32, i32) {
    %c0_i32 = arith.constant 0 : i32
    %c0_i32_0 = arith.constant 0 : i32
    %c0_i32_1 = arith.constant 0 : i32
    return %c0_i32, %c0_i32_0 : i32, i32
  }
  func.func @transform_5(%arg0: i32) -> (i32, i32) {
    %c0_i32 = arith.constant 0 : i32
    %c0_i32_0 = arith.constant 0 : i32
    %c0_i32_1 = arith.constant 0 : i32
    return %c0_i32, %c0_i32_0 : i32, i32
  }
  func.func @transform_6(%arg0: i32) -> (i32, i32) {
    %c0_i32 = arith.constant 0 : i32
    %c0_i32_0 = arith.constant 0 : i32
    %c0_i32_1 = arith.constant 0 : i32
    return %c0_i32, %c0_i32_0 : i32, i32
  }
  func.func @transform_7(%arg0: i32) -> (i32, i32) {
    %c0_i32 = arith.constant 0 : i32
    %c0_i32_0 = arith.constant 0 : i32
    %c0_i32_1 = arith.constant 0 : i32
    return %c0_i32, %c0_i32_0 : i32, i32
  }
  func.func @transform_8(%arg0: i32) -> (i32, i32) {
    %c0_i32 = arith.constant 0 : i32
    %c0_i32_0 = arith.constant 0 : i32
    %c0_i32_1 = arith.constant 0 : i32
    return %c0_i32, %c0_i32_0 : i32, i32
  }
}

</mosaic_0001>

<bundles_post_ra>
// kernel: tpu_custom_call.1
= control target key start
LH: loop header
LB: loop body
LE: loop exit
PB: predicated region body
PF: predicated region fallthrough
CT: control target
= control target key end

     0   :  { %13 = vsyncpa [#allocation7], 0  ;;  %s2227_s0 = inlined_call_operand.vmem [shape: f32[64,32], index: 0, kind: input, shape index: {}]   ;;  %s2228_s1 = inlined_call_operand.vmem [shape: f32[32,96], index: 1, kind: input, shape index: {}]   ;;  %s2229_s2 = inlined_call_operand.vmem [shape: f32[32,96], index: 2, kind: input, shape index: {}]   ;;  %s2230_s3 = inlined_call_operand.vmem [shape: f32[32,96], index: 3, kind: input, shape index: {}]   ;;  %s2231_s4 = inlined_call_operand.hbm [shape: f32[32,96], index: 4, kind: input, shape index: {}]   ;;  %s2232_s5 = inlined_call_operand.hbm [shape: f32[32,128], index: 5, kind: input, shape index: {}]   ;;  %s2233_s6 = inlined_call_operand.hbm [shape: f32[32,128], index: 6, kind: input, shape index: {}]   ;;  %s2234_s7 = inlined_call_operand.vmem [shape: f32[1,128], index: 7, kind: input, shape index: {}]   ;;  %s2235_s8 = inlined_call_operand.hbm [shape: f32[64,128], index: 8, kind: output, shape index: {}]  }
   0x1   :  { %14 = vsyncpa [#allocation10], 0 }
   0x2   :  { %15 = vsyncpa [#allocation8], 0  ;;  %s41_s29 = sshll.u32 %s2232_s5, 4  ;;  %s1804_s30 = smov [#allocation9]   ;;  %s42_s29 = int_to_ptr.hbm [resolvable:$true] %s41_s29 }
   0x3   :  { %s43_s9 = sshll.u32 %s1804_s30, 4  ;;  %s28_s12 = sshll.u32 %s2231_s4, 4  ;;  %s44_s9 = int_to_ptr.vmem [resolvable:$true] %s43_s9  ;;  %s29_s12 = int_to_ptr.hbm [resolvable:$true] %s28_s12 }
   0x4   :  { %s1805_s13 = smov 128   ;;  %s1806_s14 = smov 8  }
   0x5   :  { %49 = dma.hbm_to_vmem [thread:$0]  %s42_s29, 512, %s44_s9, [#allocation10], %s1805_s13, %s1805_s13, %s1806_s14  }
   0x6   :  { %s1807_s15 = smov [#allocation6]   ;;  %s54_s5 = sshll.u32 %s2233_s6, 4  ;;  %s55_s5 = int_to_ptr.hbm [resolvable:$true] %s54_s5 }
   0x7   :  { %s30_s16 = sshll.u32 %s1807_s15, 4  ;;  %s1808_s4 = smov [#allocation11]   ;;  %s31_s16 = int_to_ptr.vmem [resolvable:$true] %s30_s16 }
   0x8   :  { %36 = dma.hbm_to_vmem [thread:$0]  %s29_s12, 512, %s31_s16, [#allocation7], %s1805_s13, %s1805_s13, %s1806_s14  }
   0x9   :  { %s56_s19 = sshll.u32 %s1808_s4, 4  ;;  %s57_s19 = int_to_ptr.vmem [resolvable:$true] %s56_s19 }
   0xa   :  { %62 = dma.hbm_to_vmem [thread:$0]  %s55_s5, 512, %s57_s19, [#allocation10], %s1805_s13, %s1805_s13, %s1806_s14  }
   0xb   :  { %1798 = dma.done.wait [#allocation7], 512  }
   0xc   :  { %1799 = vsyncadd [#allocation7], 4294966784 }
   0xd   :  { %1800 = dma.done.wait [#allocation10], 1024  }
   0xe   :  { %1801 = vsyncadd [#allocation10], 4294966272  ;;  %v88_v0 = vld [vmem:[%s2228_s1 + $0x18] sm:$0xff]  ;;  %v87_v2 = vld [vmem:[%s2228_s1 + $0x10] sm:$0xff]  ;;  %vm89_vm0 = vcmask 261120   ;;  %v1809_v21 = vmov 0.0  }
   0xf   :  { %v167_v1 = vld [vmem:[%s2229_s2 + $0x18] sm:$0xff]  ;;  %1580 = vmatpush.msra.mxu2 %v88_v0  ;;  %v166_v3 = vld [vmem:[%s2229_s2 + $0x10] sm:$0xff]  ;;  %v86_v4 = vld [vmem:[%s2228_s1 + $0x8] sm:$0xff]  ;;  %126 = vmatpush.msra.mxu0 %v88_v0  ;;  %vm155_vm1 = vcmask 785408   ;;  %s1810_s28 = smov 64   ;;  %s1811_s29 = smov 96  }
  0x10   :  { %1584 = vmatpush.msra.mxu3 %v167_v1  ;;  %v165_v5 = vld [vmem:[%s2229_s2 + $0x8] sm:$0xff]  ;;  %180 = vmatpush.msra.mxu1 %v167_v1  ;;  %v85_v6 = vld [vmem:[%s2228_s1] sm:$0xff]  ;;  %v1903_v9 = vld [vmem:[#allocation6 + $0x18] sm:$0xff]  ;;  %s1504_s22 = sshll.u32 %s2235_s8, 4  ;;  %s1505_s22 = int_to_ptr.hbm [resolvable:$true] %s1504_s22 }
  0x11   :  { %1581 = vmatpush.msra.mxu2 %v87_v2  ;;  %v164_v7 = vld [vmem:[%s2229_s2] sm:$0xff]  ;;  %127 = vmatpush.msra.mxu0 %v87_v2  ;;  %v1908_v10 = vld [vmem:[%s2230_s3 + $0x18] sm:$0xff]  ;;  %v1912_v11 = vld [vmem:[#allocation6 + $0x10] sm:$0xff] }
  0x12   :  { %1585 = vmatpush.msra.mxu3 %v166_v3  ;;  %181 = vmatpush.msra.mxu1 %v166_v3  ;;  %v81_v8 = vld [vmem:[%s2227_s0 + $0x20] sm:$0xff]  ;;  %v1917_v12 = vld [vmem:[%s2230_s3 + $0x10] sm:$0xff]  ;;  %v1924_v14 = vld [vmem:[#allocation6 + $0x8] sm:$0xff] }
  0x13   :  { %1582 = vmatpush.msra.mxu2 %v86_v4  ;;  %128 = vmatpush.msra.mxu0 %v86_v4  ;;  %v77_v13 = vld [vmem:[%s2227_s0] sm:$0xff]  ;;  %v1929_v15 = vld [vmem:[%s2230_s3 + $0x8] sm:$0xff]  ;;  %v83_v19 = vld [vmem:[%s2227_s0 + $0x30] sm:$0xff] }
  0x14   :  { %1586 = vmatpush.msra.mxu3 %v165_v5  ;;  %182 = vmatpush.msra.mxu1 %v165_v5  ;;  %v1933_v16 = vld [vmem:[#allocation6] sm:$0xff]  ;;  %v82_v18 = vld [vmem:[%s2227_s0 + $0x28] sm:$0xff]  ;;  %v84_v20 = vld [vmem:[%s2227_s0 + $0x38] sm:$0xff] }
  0x15   :  { %1583 = vmatpush.msra.mxu2 %v85_v6  ;;  %129 = vmatpush.msra.mxu0 %v85_v6  ;;  %v1938_v17 = vld [vmem:[%s2230_s3] sm:$0xff] }
  0x16   :  { %1587 = vmatpush.msra.mxu3 %v164_v7  ;;  %1522 = vmatmul.msk.f32.vlgmr.msra.gmra.mxu2 %vm89_vm0, %v81_v8 }
  0x17   :  { %1530 = vmatmul.msk.f32.vlgmr.msra.gmra.mxu3 %vm89_vm0, %v81_v8  ;;  %241 = vmatpush.msrb.mxu2 %v1908_v10 }
  0x18   :  { %302 = vmatpush.msrb.mxu3 %v1903_v9  ;;  %183 = vmatpush.msra.mxu1 %v164_v7 }
  0x19   :  { %242 = vmatpush.msrb.mxu2 %v1917_v12  ;;  %1518 = vmatmul.msk.f32.vlgmr.msra.gmra.mxu0 %vm89_vm0, %v77_v13 }
  0x1a   :  { %303 = vmatpush.msrb.mxu3 %v1912_v11  ;;  %1526 = vmatmul.msk.f32.vlgmr.msra.gmra.mxu1 %vm89_vm0, %v77_v13  ;;  %v78_v13 = vld [vmem:[%s2227_s0 + $0x8] sm:$0xff] }
  0x1b   :  { %243 = vmatpush.msrb.mxu2 %v1929_v15 }
  0x1c   :  { %304 = vmatpush.msrb.mxu3 %v1924_v14 }
  0x1d   :  { %244 = vmatpush.msrb.mxu2 %v1938_v17 }
  0x1e   :  { %305 = vmatpush.msrb.mxu3 %v1933_v16  ;;  %1523 = vmatmul.msk.f32.gmra.mxu2 %vm89_vm0, %v82_v18 }
  0x1f   :  { %1531 = vmatmul.msk.f32.gmra.mxu3 %vm89_vm0, %v82_v18  ;;  %376 = vmatpush.msra.mxu2 %v1908_v10 }
  0x20   :  { %439 = vmatpush.msra.mxu3 %v1903_v9 }
  0x21   :  { %377 = vmatpush.msra.mxu2 %v1917_v12  ;;  %1519 = vmatmul.msk.f32.gmra.mxu0 %vm89_vm0, %v78_v13 }
  0x22   :  { %440 = vmatpush.msra.mxu3 %v1912_v11  ;;  %1527 = vmatmul.msk.f32.gmra.mxu1 %vm89_vm0, %v78_v13 }
  0x23   :  { %378 = vmatpush.msra.mxu2 %v1929_v15 }
  0x24   :  { %441 = vmatpush.msra.mxu3 %v1924_v14 }
  0x25   :  { %379 = vmatpush.msra.mxu2 %v1938_v17 }
  0x26   :  { %442 = vmatpush.msra.mxu3 %v1933_v16  ;;  %1524 = vmatmul.msk.f32.gmra.mxu2 %vm89_vm0, %v83_v19 }
  0x27   :  { %1532 = vmatmul.msk.f32.gmra.mxu3 %vm89_vm0, %v83_v19 }
  0x2e   :  { %1525 = vmatmul.msk.f32.gmra.mxu2 %vm89_vm0, %v84_v20 }
  0x2f   :  { %1533 = vmatmul.msk.f32.gmra.mxu3 %vm89_vm0, %v84_v20 }
  0x36   :  { %245 = vmatmul.f32.vlgmr.msrb.gmra.mxu2 %v1809_v21 }
  0x37   :  { %306 = vmatmul.f32.vlgmr.msrb.gmra.mxu3 %v1809_v21  ;;  %514 = vmatpush.msrb.mxu2 %v1908_v10 }
  0x38   :  { %577 = vmatpush.msrb.mxu3 %v1903_v9 }
  0x39   :  { %515 = vmatpush.msrb.mxu2 %v1917_v12 }
  0x3a   :  { %578 = vmatpush.msrb.mxu3 %v1912_v11 }
  0x3b   :  { %516 = vmatpush.msrb.mxu2 %v1929_v15 }
  0x3c   :  { %579 = vmatpush.msrb.mxu3 %v1924_v14 }
  0x3d   :  { %517 = vmatpush.msrb.mxu2 %v1938_v17 }
  0x3e   :  { %580 = vmatpush.msrb.mxu3 %v1933_v16 }
  0x96   :  { %v131_v26 = vpop.f32.mrf.mxu0 }
  0x97   :  { %156 = vst.msk [vmem:[#allocation2] sm:$0xff] %vm155_vm1, %v131_v26 }
  0x99   :  { %v143_v22 = vpop.f32.mrf.mxu2 }
  0x9a   :  { %v197_v23 = vpop.f32.mrf.mxu3  ;;  %160 = vst.msk [vmem:[#allocation2 + $0x20] sm:$0xff] %vm155_vm1, %v143_v22 }
  0x9b   :  { %213 = vst.msk [vmem:[#allocation3 + $0x20] sm:$0xff] %vm155_vm1, %v197_v23  ;;  %v79_v23 = vld [vmem:[%s2227_s0 + $0x10] sm:$0xff] }
  0x9c   :  { %1528 = vmatmul.msk.f32.gmra.mxu1 %vm89_vm0, %v79_v23  ;;  %1520 = vmatmul.msk.f32.gmra.mxu0 %vm89_vm0, %v79_v23 }
  0x9e   :  { %v225_v33 = vld [vmem:[#allocation2] sm:$0xff] }
  0xa1   :  { %v146_v24 = vpop.f32.mrf.mxu2 }
  0xa2   :  { %v200_v25 = vpop.f32.mrf.mxu3  ;;  %161 = vst.msk [vmem:[#allocation2 + $0x28] sm:$0xff] %vm155_vm1, %v146_v24 }
  0xa3   :  { %214 = vst.msk [vmem:[#allocation3 + $0x28] sm:$0xff] %vm155_vm1, %v200_v25 }
  0xa9   :  { %v149_v27 = vpop.f32.mrf.mxu2 }
  0xaa   :  { %v203_v28 = vpop.f32.mrf.mxu3  ;;  %162 = vst.msk [vmem:[#allocation2 + $0x30] sm:$0xff] %vm155_vm1, %v149_v27 }
  0xab   :  { %215 = vst.msk [vmem:[#allocation3 + $0x30] sm:$0xff] %vm155_vm1, %v203_v28 }
  0xb1   :  { %v152_v29 = vpop.f32.mrf.mxu2 }
  0xb2   :  { %v206_v30 = vpop.f32.mrf.mxu3  ;;  %163 = vst.msk [vmem:[#allocation2 + $0x38] sm:$0xff] %vm155_vm1, %v152_v29  ;;  %v80_v29 = vld [vmem:[%s2227_s0 + $0x18] sm:$0xff] }
  0xb3   :  { %216 = vst.msk [vmem:[#allocation3 + $0x38] sm:$0xff] %vm155_vm1, %v206_v30  ;;  %1529 = vmatmul.msk.f32.gmra.mxu1 %vm89_vm0, %v80_v29  ;;  %v1335_v30 = vld [vmem:[#allocation9 + $0x18] sm:$0xff]  ;;  %1521 = vmatmul.msk.f32.gmra.mxu0 %vm89_vm0, %v80_v29 }
  0xb4   :  { %1449 = vmatpush.msrb.mxu1 %v1335_v30 }
  0xb9   :  { %v246_v31 = vpop.f32.mrf.mxu2 }
  0xba   :  { %v307_v32 = vpop.f32.mrf.mxu3  ;;  %270 = vrot.lane.b32.xlu1 %v246_v31, %s1810_s28  ;;  %v289_v34 = vld [vmem:[#allocation3 + $0x38] sm:$0xff]  ;;  %v249_v35 = vadd.f32 %v246_v31, %v225_v33  ;;  %v1334_v31 = vld [vmem:[#allocation9 + $0x10] sm:$0xff] }
  0xbb   :  { %331 = vrot.lane.b32.xlu0 %v307_v32, %s1810_s28  ;;  %v310_v36 = vadd.f32 %v307_v32, %v289_v34  ;;  %v1333_v32 = vld [vmem:[#allocation9 + $0x8] sm:$0xff]  ;;  %1450 = vmatpush.msrb.mxu1 %v1334_v31 }
  0xbc   :  { %v1534_v37 = vmul.f32 -1.442695, %v249_v35 }
  0xbd   :  { %v1535_v38 = vmul.f32 -1.442695, %v310_v36  ;;  %1451 = vmatpush.msrb.mxu1 %v1333_v32 }
  0xbe   :  { %1598 = vpow2.f32 %v1534_v37 }
  0xbf   :  { %1600 = vpow2.f32 %v1535_v38  ;;  %v134_v38 = vpop.f32.mrf.mxu0 }
  0xc0   :  { %157 = vst.msk [vmem:[#allocation2 + $0x8] sm:$0xff] %vm155_vm1, %v134_v38 }
  0xc4   :  { %v1599_v39 = vpop.eup %1598 }
  0xc5   :  { %v1601_v40 = vpop.eup %1600  ;;  %v253_v41 = vadd.f32 1.0, %v1599_v39 }
  0xc6   :  { %v314_v42 = vadd.f32 1.0, %v1601_v40 }
  0xc7   :  { %1602 = vrcp.f32 %v253_v41  ;;  %vm259_vm2 = vweird.f32 %v253_v41  ;;  %v265_v51 = vand.u32 2147483648, %v253_v41  ;;  %v263_v54 = vand.u32 2147483647, %v253_v41 }
  0xc8   :  { %1604 = vrcp.f32 %v314_v42  ;;  %v326_v55 = vand.u32 2147483648, %v314_v42  ;;  %vm320_vm6 = vweird.f32 %v314_v42  ;;  %v324_v56 = vand.u32 2147483647, %v314_v42 }
  0xc9   :  { %v266_v57 = vor.u32 1.1754944e-38, %v265_v51  ;;  %vm264_vm8 = vcmp.eq.f32.partialorder %v263_v54, 8.507059e+37 }
  0xca   :  { %v327_v60 = vor.u32 1.1754944e-38, %v326_v55  ;;  %vm325_vm9 = vcmp.eq.f32.partialorder %v324_v56, 8.507059e+37 }
  0xcd   :  { %v1603_v43 = vpop.eup %1602 }
  0xce   :  { %v1605_v44 = vpop.eup %1604  ;;  %v255_v46 = vmul.f32 %v1603_v43, %v253_v41  ;;  %vm260_vm3 = vweird.f32 %v1603_v43 }
  0xcf   :  { %v316_v45 = vmul.f32 %v1605_v44, %v314_v42  ;;  %vm321_vm4 = vweird.f32 %v1605_v44  ;;  %vm261_vm5 = vmor %vm259_vm2, %vm260_vm3 }
  0xd0   :  { %v256_v48 = vsub.f32 1.0, %v255_v46  ;;  %vm322_vm7 = vmor %vm320_vm6, %vm321_vm4 }
  0xd1   :  { %v317_v47 = vsub.f32 1.0, %v316_v45 }
  0xd2   :  { %v257_v50 = vmul.f32 %v1603_v43, %v256_v48 }
  0xd3   :  { %v318_v49 = vmul.f32 %v1605_v44, %v317_v47 }
  0xd4   :  { %v258_v53 = vadd.f32 %v1603_v43, %v257_v50 }
  0xd5   :  { %v319_v52 = vadd.f32 %v1605_v44, %v318_v49  ;;  %v361_v49 = vld [vmem:[#allocation2 + $0x8] sm:$0xff] }
  0xd6   :  { %v262_v59 = vsel %vm261_vm5, %v1603_v43, %v258_v53 }
  0xd7   :  { %v323_v58 = vsel %vm322_vm7, %v1605_v44, %v319_v52  ;;  %v267_v0 = vsel %vm264_vm8, %v266_v57, %v262_v59  ;;  %v424_v44 = vld [vmem:[#allocation3 + $0x30] sm:$0xff] }
  0xd8   :  { %v328_v62 = vsel %vm325_vm9, %v327_v60, %v323_v58  ;;  %v280_v18 = vsub.f32 1.0, %v267_v0  ;;  %v286_v20 = vmul.f32 0.0, %v267_v0 }
  0xd9   :  { %v341_v24 = vsub.f32 1.0, %v328_v62  ;;  %v347_v26 = vmul.f32 0.0, %v328_v62 }
 0x12c   :  { %v271_v63 = vpop.permute.xlu1 %270 }
 0x12d   :  { %v332_v61 = vpop.permute.xlu0 %331  ;;  %v273_v2 = vmul.f32 %v271_v63, %v267_v0 }
 0x12e   :  { %v334_v1 = vmul.f32 %v332_v61, %v328_v62 }
 0x12f   :  { %275 = vrot.lane.b32.xlu2 %v273_v2, %s1810_s28 }
 0x130   :  { %336 = vrot.lane.b32.xlu0 %v334_v1, %s1810_s28 }
 0x189   :  { %v276_v3 = vpop.permute.xlu2 %275 }
 0x18a   :  { %v278_v4 = vadd.f32 %v276_v3, %v225_v33  ;;  %v1332_v33 = vld [vmem:[#allocation9] sm:$0xff] }
 0x18b   :  { %1452 = vmatpush.msrb.mxu1 %v1332_v33 }
 0x18c   :  { %1606 = vtanh.f32 %v278_v4 }
 0x192   :  { %v1607_v5 = vpop.eup %1606 }
 0x193   :  { %282 = vrot.lane.b32.xlu0 %v1607_v5, %s1811_s29 }
 0x1a2   :  { %v337_v6 = vpop.permute.xlu0 %336 }
 0x1a3   :  { %v339_v7 = vadd.f32 %v337_v6, %v289_v34  ;;  %v185_v34 = vpop.f32.mrf.mxu1 }
 0x1a4   :  { %209 = vst.msk [vmem:[#allocation3] sm:$0xff] %vm155_vm1, %v185_v34 }
 0x1a5   :  { %1608 = vtanh.f32 %v339_v7 }
 0x1ab   :  { %v1609_v8 = vpop.eup %1608  ;;  %v188_v37 = vpop.f32.mrf.mxu1 }
 0x1ac   :  { %343 = vrot.lane.b32.xlu1 %v1609_v8, %s1811_s29  ;;  %210 = vst.msk [vmem:[#allocation3 + $0x8] sm:$0xff] %vm155_vm1, %v188_v37 }
 0x1b3   :  { %v191_v40 = vpop.f32.mrf.mxu1 }
 0x1b4   :  { %211 = vst.msk [vmem:[#allocation3 + $0x10] sm:$0xff] %vm155_vm1, %v191_v40 }
 0x1bb   :  { %v194_v41 = vpop.f32.mrf.mxu1 }
 0x1bc   :  { %212 = vst.msk [vmem:[#allocation3 + $0x18] sm:$0xff] %vm155_vm1, %v194_v41  ;;  %v137_v41 = vpop.f32.mrf.mxu0 }
 0x1bd   :  { %158 = vst.msk [vmem:[#allocation2 + $0x10] sm:$0xff] %vm155_vm1, %v137_v41 }
 0x205   :  { %v283_v19 = vpop.permute.xlu0 %282 }
 0x206   :  { %v285_v21 = vmul.f32 %v283_v19, %v280_v18 }
 0x208   :  { %v1997_v22 = vadd.f32 %v286_v20, %v285_v21 }
 0x20a   :  { %350 = vrot.lane.b32.xlu1 %v1997_v22, %s1811_s29 }
 0x21e   :  { %v344_v25 = vpop.permute.xlu1 %343 }
 0x21f   :  { %v346_v27 = vmul.f32 %v344_v25, %v341_v24 }
 0x221   :  { %v2006_v28 = vadd.f32 %v347_v26, %v346_v27 }
 0x223   :  { %355 = vrot.lane.b32.xlu2 %v2006_v28, %s1811_s29 }
 0x27c   :  { %v351_v35 = vpop.permute.xlu1 %350 }
 0x27d   :  { %v356_v36 = vpop.permute.xlu2 %355  ;;  %353 = vst.msk [vmem:[#allocation4] sm:$0xff] %vm89_vm0, %v351_v35  ;;  %1536 = vmatmul.msk.f32.vlgmr.msra.gmra.mxu2 %vm89_vm0, %v351_v35 }
 0x27e   :  { %1538 = vmatmul.msk.f32.vlgmr.msra.gmra.mxu3 %vm89_vm0, %v356_v36  ;;  %359 = vst.msk [vmem:[#allocation5 + $0x38] sm:$0xff] %vm89_vm0, %v356_v36  ;;  %652 = vmatpush.msra.mxu2 %v1908_v10 }
 0x27f   :  { %715 = vmatpush.msra.mxu3 %v1903_v9 }
 0x280   :  { %653 = vmatpush.msra.mxu2 %v1917_v12 }
 0x281   :  { %716 = vmatpush.msra.mxu3 %v1912_v11 }
 0x282   :  { %654 = vmatpush.msra.mxu2 %v1929_v15 }
 0x283   :  { %717 = vmatpush.msra.mxu3 %v1924_v14 }
 0x284   :  { %v1324_v39 = vld [vmem:[#allocation4] sm:$0xff]  ;;  %655 = vmatpush.msra.mxu2 %v1938_v17 }
 0x285   :  { %718 = vmatpush.msra.mxu3 %v1933_v16  ;;  %1572 = vmatmul.msk.f32.vlgmr.msrb.gmra.mxu1 %vm89_vm0, %v1324_v39 }
 0x300   :  { %v381_v42 = vpop.f32.mrf.mxu2 }
 0x301   :  { %v444_v43 = vpop.f32.mrf.mxu3  ;;  %405 = vrot.lane.b32.xlu1 %v381_v42, %s1810_s28  ;;  %v384_v50 = vadd.f32 %v381_v42, %v361_v49 }
 0x302   :  { %468 = vrot.lane.b32.xlu2 %v444_v43, %s1810_s28  ;;  %v447_v45 = vadd.f32 %v444_v43, %v424_v44 }
 0x303   :  { %v1537_v52 = vmul.f32 -1.442695, %v384_v50 }
 0x304   :  { %v1539_v46 = vmul.f32 -1.442695, %v447_v45 }
 0x306   :  { %1610 = vpow2.f32 %v1539_v46 }
 0x30c   :  { %v1611_v47 = vpop.eup %1610 }
 0x30d   :  { %v451_v48 = vadd.f32 1.0, %v1611_v47 }
 0x30f   :  { %1612 = vrcp.f32 %v451_v48  ;;  %v463_v59 = vand.u32 2147483648, %v451_v48  ;;  %vm457_vm11 = vweird.f32 %v451_v48  ;;  %v461_v60 = vand.u32 2147483647, %v451_v48 }
 0x310   :  { %1614 = vpow2.f32 %v1537_v52 }
 0x311   :  { %v464_v62 = vor.u32 1.1754944e-38, %v463_v59  ;;  %vm462_vm13 = vcmp.eq.f32.partialorder %v461_v60, 8.507059e+37 }
 0x315   :  { %v1613_v51 = vpop.eup %1612 }
 0x316   :  { %v453_v53 = vmul.f32 %v1613_v51, %v451_v48  ;;  %v1615_v55 = vpop.eup %1614  ;;  %vm458_vm10 = vweird.f32 %v1613_v51 }
 0x317   :  { %v388_v57 = vadd.f32 1.0, %v1615_v55  ;;  %vm459_vm12 = vmor %vm457_vm11, %vm458_vm10 }
 0x318   :  { %v454_v54 = vsub.f32 1.0, %v453_v53 }
 0x319   :  { %1616 = vrcp.f32 %v388_v57  ;;  %v400_v7 = vand.u32 2147483648, %v388_v57  ;;  %vm394_vm15 = vweird.f32 %v388_v57  ;;  %v398_v8 = vand.u32 2147483647, %v388_v57 }
 0x31a   :  { %v455_v56 = vmul.f32 %v1613_v51, %v454_v54 }
 0x31b   :  { %v401_v18 = vor.u32 1.1754944e-38, %v400_v7  ;;  %vm399_vm3 = vcmp.eq.f32.partialorder %v398_v8, 8.507059e+37 }
 0x31c   :  { %v456_v58 = vadd.f32 %v1613_v51, %v455_v56 }
 0x31e   :  { %v460_v61 = vsel %vm459_vm12, %v1613_v51, %v456_v58 }
 0x31f   :  { %v465_v0 = vsel %vm462_vm13, %v464_v62, %v460_v61  ;;  %v1617_v2 = vpop.eup %1616 }
 0x320   :  { %v390_v3 = vmul.f32 %v1617_v2, %v388_v57  ;;  %vm395_vm14 = vweird.f32 %v1617_v2  ;;  %v478_v30 = vsub.f32 1.0, %v465_v0  ;;  %v484_v32 = vmul.f32 %v465_v0, %v2006_v28 }
 0x321   :  { %vm396_vm2 = vmor %vm394_vm15, %vm395_vm14 }
 0x322   :  { %v391_v4 = vsub.f32 1.0, %v390_v3 }
 0x324   :  { %v392_v5 = vmul.f32 %v1617_v2, %v391_v4 }
 0x326   :  { %v393_v6 = vadd.f32 %v1617_v2, %v392_v5 }
 0x328   :  { %v397_v13 = vsel %vm396_vm2, %v1617_v2, %v393_v6 }
 0x329   :  { %v402_v20 = vsel %vm399_vm3, %v401_v18, %v397_v13 }
 0x32a   :  { %v415_v35 = vsub.f32 1.0, %v402_v20  ;;  %v421_v37 = vmul.f32 %v402_v20, %v1997_v22 }
 0x35c   :  { %v469_v63 = vpop.permute.xlu2 %468 }
 0x35d   :  { %v471_v1 = vmul.f32 %v469_v63, %v465_v0 }
 0x35f   :  { %473 = vrot.lane.b32.xlu0 %v471_v1, %s1810_s28 }
 0x373   :  { %v406_v19 = vpop.permute.xlu1 %405 }
 0x374   :  { %v408_v21 = vmul.f32 %v406_v19, %v402_v20 }
 0x376   :  { %410 = vrot.lane.b32.xlu0 %v408_v21, %s1810_s28 }
 0x3d1   :  { %v474_v23 = vpop.permute.xlu0 %473 }
 0x3d2   :  { %v476_v24 = vadd.f32 %v474_v23, %v424_v44  ;;  %v562_v44 = vld [vmem:[#allocation3 + $0x28] sm:$0xff] }
 0x3d4   :  { %1618 = vtanh.f32 %v476_v24 }
 0x3da   :  { %v1619_v25 = vpop.eup %1618 }
 0x3db   :  { %480 = vrot.lane.b32.xlu2 %v1619_v25, %s1811_s29 }
 0x3e8   :  { %v411_v26 = vpop.permute.xlu0 %410 }
 0x3e9   :  { %v413_v27 = vadd.f32 %v411_v26, %v361_v49  ;;  %v499_v49 = vld [vmem:[#allocation2 + $0x10] sm:$0xff] }
 0x3eb   :  { %1620 = vtanh.f32 %v413_v27 }
 0x3f1   :  { %v1621_v29 = vpop.eup %1620 }
 0x3f2   :  { %417 = vrot.lane.b32.xlu2 %v1621_v29, %s1811_s29 }
 0x435   :  { %v481_v31 = vpop.permute.xlu2 %480 }
 0x436   :  { %v483_v33 = vmul.f32 %v481_v31, %v478_v30 }
 0x438   :  { %v2040_v34 = vadd.f32 %v484_v32, %v483_v33 }
 0x43a   :  { %493 = vrot.lane.b32.xlu1 %v2040_v34, %s1811_s29 }
 0x44c   :  { %v418_v36 = vpop.permute.xlu2 %417 }
 0x44d   :  { %v420_v38 = vmul.f32 %v418_v36, %v415_v35 }
 0x44f   :  { %v2045_v39 = vadd.f32 %v421_v37, %v420_v38 }
 0x451   :  { %487 = vrot.lane.b32.xlu0 %v2045_v39, %s1811_s29 }
 0x4ac   :  { %v494_v40 = vpop.permute.xlu1 %493 }
 0x4ad   :  { %497 = vst.msk [vmem:[#allocation5 + $0x30] sm:$0xff] %vm89_vm0, %v494_v40  ;;  %1542 = vmatmul.msk.f32.vlgmr.msrb.gmra.mxu3 %vm89_vm0, %v494_v40 }
 0x4ae   :  { %853 = vmatpush.msrb.mxu3 %v1903_v9 }
 0x4b0   :  { %854 = vmatpush.msrb.mxu3 %v1912_v11 }
 0x4b2   :  { %855 = vmatpush.msrb.mxu3 %v1924_v14 }
 0x4b4   :  { %856 = vmatpush.msrb.mxu3 %v1933_v16 }
 0x4c3   :  { %v488_v22 = vpop.permute.xlu0 %487 }
 0x4c4   :  { %491 = vst.msk [vmem:[#allocation4 + $0x8] sm:$0xff] %vm89_vm0, %v488_v22  ;;  %1540 = vmatmul.msk.f32.vlgmr.msrb.gmra.mxu2 %vm89_vm0, %v488_v22 }
 0x4c5   :  { %790 = vmatpush.msrb.mxu2 %v1908_v10 }
 0x4c7   :  { %791 = vmatpush.msrb.mxu2 %v1917_v12 }
 0x4c9   :  { %792 = vmatpush.msrb.mxu2 %v1929_v15 }
 0x4cb   :  { %v1325_v28 = vld [vmem:[#allocation4 + $0x8] sm:$0xff]  ;;  %793 = vmatpush.msrb.mxu2 %v1938_v17 }
 0x4cc   :  { %1573 = vmatmul.msk.f32.gmra.mxu1 %vm89_vm0, %v1325_v28  ;;  %v140_v28 = vpop.f32.mrf.mxu0 }
 0x4cd   :  { %159 = vst.msk [vmem:[#allocation2 + $0x18] sm:$0xff] %vm155_vm1, %v140_v28 }
 0x530   :  { %v582_v42 = vpop.f32.mrf.mxu3 }
 0x531   :  { %606 = vrot.lane.b32.xlu1 %v582_v42, %s1810_s28  ;;  %v585_v45 = vadd.f32 %v582_v42, %v562_v44 }
 0x533   :  { %v1543_v46 = vmul.f32 -1.442695, %v585_v45 }
 0x535   :  { %1622 = vpow2.f32 %v1543_v46 }
 0x53b   :  { %v1623_v47 = vpop.eup %1622 }
 0x53c   :  { %v589_v48 = vadd.f32 1.0, %v1623_v47  ;;  %v637_v47 = vld [vmem:[#allocation2 + $0x18] sm:$0xff] }
 0x53e   :  { %1624 = vrcp.f32 %v589_v48  ;;  %v601_v59 = vand.u32 2147483648, %v589_v48  ;;  %vm595_vm5 = vweird.f32 %v589_v48  ;;  %v599_v60 = vand.u32 2147483647, %v589_v48 }
 0x540   :  { %v602_v62 = vor.u32 1.1754944e-38, %v601_v59  ;;  %vm600_vm7 = vcmp.eq.f32.partialorder %v599_v60, 8.507059e+37 }
 0x544   :  { %v1625_v51 = vpop.eup %1624 }
 0x545   :  { %v591_v53 = vmul.f32 %v1625_v51, %v589_v48  ;;  %vm596_vm4 = vweird.f32 %v1625_v51 }
 0x546   :  { %vm597_vm6 = vmor %vm595_vm5, %vm596_vm4 }
 0x547   :  { %v519_v43 = vpop.f32.mrf.mxu2  ;;  %v592_v54 = vsub.f32 1.0, %v591_v53 }
 0x548   :  { %543 = vrot.lane.b32.xlu0 %v519_v43, %s1810_s28  ;;  %v522_v50 = vadd.f32 %v519_v43, %v499_v49 }
 0x549   :  { %v593_v56 = vmul.f32 %v1625_v51, %v592_v54 }
 0x54a   :  { %v1541_v52 = vmul.f32 -1.442695, %v522_v50 }
 0x54b   :  { %v594_v58 = vadd.f32 %v1625_v51, %v593_v56 }
 0x54c   :  { %1626 = vpow2.f32 %v1541_v52 }
 0x54d   :  { %v598_v61 = vsel %vm597_vm6, %v1625_v51, %v594_v58 }
 0x54e   :  { %v603_v0 = vsel %vm600_vm7, %v602_v62, %v598_v61 }
 0x54f   :  { %v616_v30 = vsub.f32 1.0, %v603_v0  ;;  %v622_v32 = vmul.f32 %v603_v0, %v2040_v34 }
 0x552   :  { %v1627_v55 = vpop.eup %1626 }
 0x553   :  { %v526_v57 = vadd.f32 1.0, %v1627_v55 }
 0x555   :  { %1628 = vrcp.f32 %v526_v57  ;;  %v538_v7 = vand.u32 2147483648, %v526_v57  ;;  %vm532_vm9 = vweird.f32 %v526_v57  ;;  %v536_v8 = vand.u32 2147483647, %v526_v57 }
 0x557   :  { %v539_v18 = vor.u32 1.1754944e-38, %v538_v7  ;;  %vm537_vm11 = vcmp.eq.f32.partialorder %v536_v8, 8.507059e+37 }
 0x55b   :  { %v1629_v2 = vpop.eup %1628 }
 0x55c   :  { %v528_v3 = vmul.f32 %v1629_v2, %v526_v57  ;;  %vm533_vm8 = vweird.f32 %v1629_v2 }
 0x55d   :  { %vm534_vm10 = vmor %vm532_vm9, %vm533_vm8 }
 0x55e   :  { %v529_v4 = vsub.f32 1.0, %v528_v3 }
 0x560   :  { %v530_v5 = vmul.f32 %v1629_v2, %v529_v4 }
 0x562   :  { %v531_v6 = vadd.f32 %v1629_v2, %v530_v5 }
 0x564   :  { %v535_v13 = vsel %vm534_vm10, %v1629_v2, %v531_v6 }
 0x565   :  { %v540_v20 = vsel %vm537_vm11, %v539_v18, %v535_v13 }
 0x566   :  { %v553_v36 = vsub.f32 1.0, %v540_v20  ;;  %v559_v38 = vmul.f32 %v540_v20, %v2045_v39 }
 0x5a3   :  { %v607_v63 = vpop.permute.xlu1 %606 }
 0x5a4   :  { %v609_v1 = vmul.f32 %v607_v63, %v603_v0 }
 0x5a6   :  { %611 = vrot.lane.b32.xlu2 %v609_v1, %s1810_s28 }
 0x5ba   :  { %v544_v19 = vpop.permute.xlu0 %543 }
 0x5bb   :  { %v546_v21 = vmul.f32 %v544_v19, %v540_v20 }
 0x5bd   :  { %548 = vrot.lane.b32.xlu2 %v546_v21, %s1810_s28 }
 0x600   :  { %v612_v23 = vpop.permute.xlu2 %611 }
 0x601   :  { %v614_v24 = vadd.f32 %v612_v23, %v562_v44  ;;  %v700_v44 = vld [vmem:[#allocation3 + $0x20] sm:$0xff] }
 0x603   :  { %1630 = vtanh.f32 %v614_v24 }
 0x609   :  { %v1631_v25 = vpop.eup %1630 }
 0x60a   :  { %618 = vrot.lane.b32.xlu1 %v1631_v25, %s1811_s29 }
 0x617   :  { %v549_v26 = vpop.permute.xlu2 %548 }
 0x618   :  { %v551_v27 = vadd.f32 %v549_v26, %v499_v49 }
 0x61a   :  { %1632 = vtanh.f32 %v551_v27 }
 0x620   :  { %v1633_v29 = vpop.eup %1632 }
 0x621   :  { %555 = vrot.lane.b32.xlu1 %v1633_v29, %s1811_s29 }
 0x67c   :  { %v619_v31 = vpop.permute.xlu1 %618 }
 0x67d   :  { %v621_v33 = vmul.f32 %v619_v31, %v616_v30 }
 0x67f   :  { %v2070_v35 = vadd.f32 %v622_v32, %v621_v33 }
 0x681   :  { %631 = vrot.lane.b32.xlu0 %v2070_v35, %s1811_s29 }
 0x693   :  { %v556_v37 = vpop.permute.xlu1 %555 }
 0x694   :  { %v558_v40 = vmul.f32 %v556_v37, %v553_v36 }
 0x696   :  { %v2075_v22 = vadd.f32 %v559_v38, %v558_v40 }
 0x698   :  { %625 = vrot.lane.b32.xlu2 %v2075_v22, %s1811_s29 }
 0x6f2   :  { %v626_v41 = vpop.permute.xlu2 %625 }
 0x6f3   :  { %v632_v34 = vpop.permute.xlu0 %631  ;;  %1544 = vmatmul.msk.f32.vlgmr.msra.gmra.mxu2 %vm89_vm0, %v626_v41  ;;  %629 = vst.msk [vmem:[#allocation4 + $0x10] sm:$0xff] %vm89_vm0, %v626_v41 }
 0x6f4   :  { %635 = vst.msk [vmem:[#allocation5 + $0x28] sm:$0xff] %vm89_vm0, %v632_v34  ;;  %1546 = vmatmul.msk.f32.vlgmr.msra.gmra.mxu3 %vm89_vm0, %v632_v34  ;;  %928 = vmatpush.msra.mxu2 %v1908_v10 }
 0x6f5   :  { %991 = vmatpush.msra.mxu3 %v1903_v9 }
 0x6f6   :  { %929 = vmatpush.msra.mxu2 %v1917_v12 }
 0x6f7   :  { %992 = vmatpush.msra.mxu3 %v1912_v11 }
 0x6f8   :  { %930 = vmatpush.msra.mxu2 %v1929_v15 }
 0x6f9   :  { %993 = vmatpush.msra.mxu3 %v1924_v14 }
 0x6fa   :  { %931 = vmatpush.msra.mxu2 %v1938_v17  ;;  %v1326_v39 = vld [vmem:[#allocation4 + $0x10] sm:$0xff] }
 0x6fb   :  { %994 = vmatpush.msra.mxu3 %v1933_v16  ;;  %1574 = vmatmul.msk.f32.gmra.mxu1 %vm89_vm0, %v1326_v39 }
 0x776   :  { %v657_v42 = vpop.f32.mrf.mxu2 }
 0x777   :  { %v720_v43 = vpop.f32.mrf.mxu3  ;;  %681 = vrot.lane.b32.xlu2 %v657_v42, %s1810_s28  ;;  %v660_v48 = vadd.f32 %v657_v42, %v637_v47 }
 0x778   :  { %744 = vrot.lane.b32.xlu0 %v720_v43, %s1810_s28  ;;  %v723_v45 = vadd.f32 %v720_v43, %v700_v44 }
 0x779   :  { %v1545_v49 = vmul.f32 -1.442695, %v660_v48 }
 0x77a   :  { %v1547_v46 = vmul.f32 -1.442695, %v723_v45 }
 0x77c   :  { %1634 = vpow2.f32 %v1547_v46 }
 0x77d   :  { %1636 = vpow2.f32 %v1545_v49 }
 0x782   :  { %v1635_v50 = vpop.eup %1634 }
 0x783   :  { %v727_v51 = vadd.f32 1.0, %v1635_v50  ;;  %v1637_v52 = vpop.eup %1636 }
 0x784   :  { %v664_v53 = vadd.f32 1.0, %v1637_v52  ;;  %v775_v52 = vld [vmem:[#allocation2 + $0x20] sm:$0xff] }
 0x785   :  { %1638 = vrcp.f32 %v727_v51  ;;  %v739_v62 = vand.u32 2147483648, %v727_v51  ;;  %vm733_vm12 = vweird.f32 %v727_v51  ;;  %v737_v63 = vand.u32 2147483647, %v727_v51 }
 0x786   :  { %1640 = vrcp.f32 %v664_v53  ;;  %v676_v7 = vand.u32 2147483648, %v664_v53  ;;  %vm670_vm2 = vweird.f32 %v664_v53  ;;  %v674_v8 = vand.u32 2147483647, %v664_v53 }
 0x787   :  { %v740_v2 = vor.u32 1.1754944e-38, %v739_v62  ;;  %vm738_vm14 = vcmp.eq.f32.partialorder %v737_v63, 8.507059e+37 }
 0x788   :  { %v677_v19 = vor.u32 1.1754944e-38, %v676_v7  ;;  %vm675_vm4 = vcmp.eq.f32.partialorder %v674_v8, 8.507059e+37 }
 0x78b   :  { %v1639_v54 = vpop.eup %1638 }
 0x78c   :  { %v729_v55 = vmul.f32 %v1639_v54, %v727_v51  ;;  %v1641_v57 = vpop.eup %1640  ;;  %vm734_vm1 = vweird.f32 %v1639_v54 }
 0x78d   :  { %v666_v58 = vmul.f32 %v1641_v57, %v664_v53  ;;  %vm735_vm13 = vmor %vm733_vm12, %vm734_vm1  ;;  %vm671_vm15 = vweird.f32 %v1641_v57 }
 0x78e   :  { %v730_v56 = vsub.f32 1.0, %v729_v55  ;;  %vm672_vm3 = vmor %vm670_vm2, %vm671_vm15 }
 0x78f   :  { %v667_v60 = vsub.f32 1.0, %v666_v58 }
 0x790   :  { %v731_v59 = vmul.f32 %v1639_v54, %v730_v56 }
 0x791   :  { %v668_v0 = vmul.f32 %v1641_v57, %v667_v60 }
 0x792   :  { %v732_v61 = vadd.f32 %v1639_v54, %v731_v59 }
 0x793   :  { %v669_v5 = vadd.f32 %v1641_v57, %v668_v0 }
 0x794   :  { %v736_v1 = vsel %vm735_vm13, %v1639_v54, %v732_v61 }
 0x795   :  { %v741_v4 = vsel %vm738_vm14, %v740_v2, %v736_v1  ;;  %v673_v13 = vsel %vm672_vm3, %v1641_v57, %v669_v5 }
 0x796   :  { %v678_v20 = vsel %vm675_vm4, %v677_v19, %v673_v13  ;;  %v754_v30 = vsub.f32 1.0, %v741_v4  ;;  %v760_v32 = vmul.f32 %v741_v4, %v2070_v35 }
 0x797   :  { %v691_v37 = vsub.f32 1.0, %v678_v20  ;;  %v697_v40 = vmul.f32 %v678_v20, %v2075_v22 }
 0x7d1   :  { %v682_v18 = vpop.permute.xlu2 %681 }
 0x7d2   :  { %v684_v21 = vmul.f32 %v682_v18, %v678_v20 }
 0x7ea   :  { %v745_v3 = vpop.permute.xlu0 %744 }
 0x7eb   :  { %v747_v6 = vmul.f32 %v745_v3, %v741_v4 }
 0x7ed   :  { %749 = vrot.lane.b32.xlu1 %v747_v6, %s1810_s28 }
 0x7f5   :  { %686 = vrot.lane.b32.xlu1 %v684_v21, %s1810_s28 }
 0x85f   :  { %v750_v23 = vpop.permute.xlu1 %749 }
 0x860   :  { %v752_v24 = vadd.f32 %v750_v23, %v700_v44 }
 0x862   :  { %1642 = vtanh.f32 %v752_v24 }
 0x867   :  { %v687_v25 = vpop.permute.xlu1 %686 }
 0x868   :  { %v1643_v26 = vpop.eup %1642  ;;  %v689_v27 = vadd.f32 %v687_v25, %v637_v47 }
 0x869   :  { %756 = vrot.lane.b32.xlu0 %v1643_v26, %s1811_s29 }
 0x86a   :  { %1644 = vtanh.f32 %v689_v27 }
 0x870   :  { %v1645_v29 = vpop.eup %1644 }
 0x871   :  { %693 = vrot.lane.b32.xlu0 %v1645_v29, %s1811_s29 }
 0x8db   :  { %v757_v31 = vpop.permute.xlu0 %756 }
 0x8dc   :  { %v759_v33 = vmul.f32 %v757_v31, %v754_v30 }
 0x8de   :  { %v2100_v36 = vadd.f32 %v760_v32, %v759_v33  ;;  %v1694_v32 = vld [vmem:[#allocation6 + $0x18] sm:$0xff]  ;;  %v1695_v33 = vld [vmem:[#allocation6 + $0x10] sm:$0xff] }
 0x8e0   :  { %769 = vrot.lane.b32.xlu2 %v2100_v36, %s1811_s29 }
 0x8e3   :  { %v694_v38 = vpop.permute.xlu0 %693 }
 0x8e4   :  { %v696_v28 = vmul.f32 %v694_v38, %v691_v37  ;;  %v1697_v37 = vld [vmem:[#allocation6] sm:$0xff] }
 0x8e6   :  { %v2105_v34 = vadd.f32 %v697_v40, %v696_v28  ;;  %v1698_v40 = vld [vmem:[%s2230_s3 + $0x18] sm:$0xff]  ;;  %v1699_v28 = vld [vmem:[%s2230_s3 + $0x10] sm:$0xff] }
 0x8e8   :  { %763 = vrot.lane.b32.xlu1 %v2105_v34, %s1811_s29 }
 0x93a   :  { %v770_v41 = vpop.permute.xlu2 %769 }
 0x93b   :  { %773 = vst.msk [vmem:[#allocation5 + $0x20] sm:$0xff] %vm89_vm0, %v770_v41  ;;  %1550 = vmatmul.msk.f32.vlgmr.msrb.gmra.mxu3 %vm89_vm0, %v770_v41 }
 0x93c   :  { %1129 = vmatpush.msrb.mxu3 %v1903_v9 }
 0x93e   :  { %1130 = vmatpush.msrb.mxu3 %v1912_v11 }
 0x940   :  { %1131 = vmatpush.msrb.mxu3 %v1924_v14  ;;  %v838_v14 = vld [vmem:[#allocation3 + $0x18] sm:$0xff] }
 0x942   :  { %1132 = vmatpush.msrb.mxu3 %v1933_v16 }
 0x95a   :  { %v764_v35 = vpop.permute.xlu1 %763 }
 0x95b   :  { %767 = vst.msk [vmem:[#allocation4 + $0x18] sm:$0xff] %vm89_vm0, %v764_v35  ;;  %1548 = vmatmul.msk.f32.vlgmr.msrb.gmra.mxu2 %vm89_vm0, %v764_v35  ;;  %v1701_v35 = vld [vmem:[%s2230_s3] sm:$0xff] }
 0x95c   :  { %1066 = vmatpush.msrb.mxu2 %v1908_v10 }
 0x95e   :  { %1067 = vmatpush.msrb.mxu2 %v1917_v12 }
 0x960   :  { %1068 = vmatpush.msrb.mxu2 %v1929_v15 }
 0x962   :  { %v1327_v22 = vld [vmem:[#allocation4 + $0x18] sm:$0xff]  ;;  %1069 = vmatpush.msrb.mxu2 %v1938_v17 }
 0x963   :  { %1575 = vmatmul.msk.f32.gmra.mxu1 %vm89_vm0, %v1327_v22 }
 0x9be   :  { %v858_v9 = vpop.f32.mrf.mxu3 }
 0x9bf   :  { %882 = vrot.lane.b32.xlu2 %v858_v9, %s1810_s28  ;;  %v861_v16 = vadd.f32 %v858_v9, %v838_v14 }
 0x9c1   :  { %v1551_v39 = vmul.f32 -1.442695, %v861_v16 }
 0x9c3   :  { %1646 = vpow2.f32 %v1551_v39 }
 0x9c9   :  { %v1647_v10 = vpop.eup %1646 }
 0x9ca   :  { %v865_v42 = vadd.f32 1.0, %v1647_v10 }
 0x9cc   :  { %1648 = vrcp.f32 %v865_v42  ;;  %v877_v45 = vand.u32 2147483648, %v865_v42  ;;  %vm871_vm6 = vweird.f32 %v865_v42  ;;  %v875_v46 = vand.u32 2147483647, %v865_v42 }
 0x9ce   :  { %v878_v48 = vor.u32 1.1754944e-38, %v877_v45  ;;  %vm876_vm8 = vcmp.eq.f32.partialorder %v875_v46, 8.507059e+37 }
 0x9d2   :  { %v1649_v12 = vpop.eup %1648 }
 0x9d3   :  { %v867_v15 = vmul.f32 %v1649_v12, %v865_v42  ;;  %vm872_vm5 = vweird.f32 %v1649_v12 }
 0x9d4   :  { %vm873_vm7 = vmor %vm871_vm6, %vm872_vm5 }
 0x9d5   :  { %v868_v43 = vsub.f32 1.0, %v867_v15 }
 0x9d7   :  { %v869_v44 = vmul.f32 %v1649_v12, %v868_v43 }
 0x9d9   :  { %v870_v17 = vadd.f32 %v1649_v12, %v869_v44 }
 0x9db   :  { %v874_v47 = vsel %vm873_vm7, %v1649_v12, %v870_v17 }
 0x9dc   :  { %v879_v50 = vsel %vm876_vm8, %v878_v48, %v874_v47 }
 0x9dd   :  { %v892_v19 = vsub.f32 1.0, %v879_v50  ;;  %v898_v21 = vmul.f32 %v879_v50, %v2100_v36  ;;  %v1696_v36 = vld [vmem:[#allocation6 + $0x8] sm:$0xff] }
 0x9de   :  { %v795_v11 = vpop.f32.mrf.mxu2 }
 0x9df   :  { %819 = vrot.lane.b32.xlu1 %v795_v11, %s1810_s28  ;;  %v798_v53 = vadd.f32 %v795_v11, %v775_v52  ;;  %v976_v11 = vld [vmem:[#allocation3 + $0x10] sm:$0xff] }
 0x9e1   :  { %v1549_v54 = vmul.f32 -1.442695, %v798_v53 }
 0x9e3   :  { %1650 = vpow2.f32 %v1549_v54 }
 0x9e9   :  { %v1651_v55 = vpop.eup %1650 }
 0x9ea   :  { %v802_v56 = vadd.f32 1.0, %v1651_v55 }
 0x9ec   :  { %1652 = vrcp.f32 %v802_v56  ;;  %v814_v62 = vand.u32 2147483648, %v802_v56  ;;  %vm808_vm10 = vweird.f32 %v802_v56  ;;  %v812_v63 = vand.u32 2147483647, %v802_v56 }
 0x9ee   :  { %v815_v1 = vor.u32 1.1754944e-38, %v814_v62  ;;  %vm813_vm1 = vcmp.eq.f32.partialorder %v812_v63, 8.507059e+37 }
 0x9f2   :  { %v1653_v57 = vpop.eup %1652 }
 0x9f3   :  { %v804_v58 = vmul.f32 %v1653_v57, %v802_v56  ;;  %vm809_vm9 = vweird.f32 %v1653_v57 }
 0x9f4   :  { %vm810_vm11 = vmor %vm808_vm10, %vm809_vm9 }
 0x9f5   :  { %v805_v59 = vsub.f32 1.0, %v804_v58 }
 0x9f7   :  { %v806_v60 = vmul.f32 %v1653_v57, %v805_v59 }
 0x9f9   :  { %v807_v61 = vadd.f32 %v1653_v57, %v806_v60 }
 0x9fb   :  { %v811_v0 = vsel %vm810_vm11, %v1653_v57, %v807_v61 }
 0x9fc   :  { %v816_v3 = vsel %vm813_vm1, %v815_v1, %v811_v0 }
 0x9fd   :  { %v829_v25 = vsub.f32 1.0, %v816_v3  ;;  %v835_v27 = vmul.f32 %v816_v3, %v2105_v34  ;;  %v1700_v34 = vld [vmem:[%s2230_s3 + $0x8] sm:$0xff] }
 0xa19   :  { %v883_v49 = vpop.permute.xlu2 %882 }
 0xa1a   :  { %v885_v51 = vmul.f32 %v883_v49, %v879_v50 }
 0xa1c   :  { %887 = vrot.lane.b32.xlu0 %v885_v51, %s1810_s28  ;;  %v913_v51 = vld [vmem:[#allocation2 + $0x28] sm:$0xff] }
 0xa51   :  { %v820_v2 = vpop.permute.xlu1 %819 }
 0xa52   :  { %v822_v4 = vmul.f32 %v820_v2, %v816_v3 }
 0xa54   :  { %824 = vrot.lane.b32.xlu0 %v822_v4, %s1810_s28 }
 0xa8e   :  { %v888_v5 = vpop.permute.xlu0 %887 }
 0xa8f   :  { %v890_v6 = vadd.f32 %v888_v5, %v838_v14 }
 0xa91   :  { %1654 = vtanh.f32 %v890_v6 }
 0xa97   :  { %v1655_v7 = vpop.eup %1654 }
 0xa98   :  { %894 = vrot.lane.b32.xlu2 %v1655_v7, %s1811_s29 }
 0xac6   :  { %v825_v8 = vpop.permute.xlu0 %824 }
 0xac7   :  { %v827_v13 = vadd.f32 %v825_v8, %v775_v52 }
 0xac9   :  { %1656 = vtanh.f32 %v827_v13 }
 0xacf   :  { %v1657_v18 = vpop.eup %1656 }
 0xad0   :  { %831 = vrot.lane.b32.xlu2 %v1657_v18, %s1811_s29 }
 0xaf2   :  { %v895_v20 = vpop.permute.xlu2 %894 }
 0xaf3   :  { %v897_v23 = vmul.f32 %v895_v20, %v892_v19 }
 0xaf5   :  { %v2129_v24 = vadd.f32 %v898_v21, %v897_v23 }
 0xaf7   :  { %907 = vrot.lane.b32.xlu1 %v2129_v24, %s1811_s29 }
 0xb2a   :  { %v832_v26 = vpop.permute.xlu2 %831 }
 0xb2b   :  { %v834_v29 = vmul.f32 %v832_v26, %v829_v25 }
 0xb2d   :  { %v2134_v30 = vadd.f32 %v835_v27, %v834_v29 }
 0xb2f   :  { %901 = vrot.lane.b32.xlu0 %v2134_v30, %s1811_s29 }
 0xb69   :  { %v908_v31 = vpop.permute.xlu1 %907 }
 0xb6a   :  { %911 = vst.msk [vmem:[#allocation5 + $0x18] sm:$0xff] %vm89_vm0, %v908_v31  ;;  %1554 = vmatmul.msk.f32.vlgmr.msra.gmra.mxu3 %vm89_vm0, %v908_v31 }
 0xb6b   :  { %1266 = vmatpush.msra.mxu3 %v1694_v32 }
 0xb6d   :  { %1267 = vmatpush.msra.mxu3 %v1695_v33 }
 0xb6f   :  { %1268 = vmatpush.msra.mxu3 %v1696_v36 }
 0xb71   :  { %1269 = vmatpush.msra.mxu3 %v1697_v37  ;;  %v1114_v37 = vld [vmem:[#allocation3 + $0x8] sm:$0xff] }
 0xba1   :  { %v902_v38 = vpop.permute.xlu0 %901 }
 0xba2   :  { %905 = vst.msk [vmem:[#allocation4 + $0x20] sm:$0xff] %vm89_vm0, %v902_v38  ;;  %1552 = vmatmul.msk.f32.vlgmr.msra.gmra.mxu2 %vm89_vm0, %v902_v38 }
 0xba3   :  { %1204 = vmatpush.msra.mxu2 %v1698_v40 }
 0xba5   :  { %1205 = vmatpush.msra.mxu2 %v1699_v28  ;;  %v1051_v28 = vld [vmem:[#allocation2 + $0x30] sm:$0xff] }
 0xba7   :  { %1206 = vmatpush.msra.mxu2 %v1700_v34 }
 0xba9   :  { %v1328_v41 = vld [vmem:[#allocation4 + $0x20] sm:$0xff]  ;;  %1207 = vmatpush.msra.mxu2 %v1701_v35 }
 0xbaa   :  { %1576 = vmatmul.msk.f32.gmra.mxu1 %vm89_vm0, %v1328_v41 }
 0xbed   :  { %v996_v22 = vpop.f32.mrf.mxu3 }
 0xbee   :  { %1020 = vrot.lane.b32.xlu1 %v996_v22, %s1810_s28  ;;  %v999_v14 = vadd.f32 %v996_v22, %v976_v11 }
 0xbf0   :  { %v1555_v16 = vmul.f32 -1.442695, %v999_v14 }
 0xbf2   :  { %1658 = vpow2.f32 %v1555_v16 }
 0xbf8   :  { %v1659_v39 = vpop.eup %1658 }
 0xbf9   :  { %v1003_v10 = vadd.f32 1.0, %v1659_v39 }
 0xbfb   :  { %1660 = vrcp.f32 %v1003_v10  ;;  %v1015_v17 = vand.u32 2147483648, %v1003_v10  ;;  %vm1009_vm13 = vweird.f32 %v1003_v10  ;;  %v1013_v45 = vand.u32 2147483647, %v1003_v10 }
 0xbfd   :  { %v1016_v47 = vor.u32 1.1754944e-38, %v1015_v17  ;;  %vm1014_vm15 = vcmp.eq.f32.partialorder %v1013_v45, 8.507059e+37 }
 0xc01   :  { %v1661_v42 = vpop.eup %1660 }
 0xc02   :  { %v1005_v12 = vmul.f32 %v1661_v42, %v1003_v10  ;;  %vm1010_vm12 = vweird.f32 %v1661_v42 }
 0xc03   :  { %vm1011_vm14 = vmor %vm1009_vm13, %vm1010_vm12 }
 0xc04   :  { %v1006_v15 = vsub.f32 1.0, %v1005_v12 }
 0xc06   :  { %v1007_v43 = vmul.f32 %v1661_v42, %v1006_v15 }
 0xc08   :  { %v1008_v44 = vadd.f32 %v1661_v42, %v1007_v43 }
 0xc0a   :  { %v1012_v46 = vsel %vm1011_vm14, %v1661_v42, %v1008_v44 }
 0xc0b   :  { %v1017_v49 = vsel %vm1014_vm15, %v1016_v47, %v1012_v46 }
 0xc0c   :  { %v1030_v18 = vsub.f32 1.0, %v1017_v49  ;;  %v1036_v20 = vmul.f32 %v1017_v49, %v2129_v24 }
 0xc25   :  { %v933_v9 = vpop.f32.mrf.mxu2 }
 0xc26   :  { %957 = vrot.lane.b32.xlu0 %v933_v9, %s1810_s28  ;;  %v936_v52 = vadd.f32 %v933_v9, %v913_v51 }
 0xc28   :  { %v1553_v53 = vmul.f32 -1.442695, %v936_v52 }
 0xc2a   :  { %1662 = vpow2.f32 %v1553_v53 }
 0xc30   :  { %v1663_v54 = vpop.eup %1662 }
 0xc31   :  { %v940_v55 = vadd.f32 1.0, %v1663_v54 }
 0xc33   :  { %1664 = vrcp.f32 %v940_v55  ;;  %v952_v61 = vand.u32 2147483648, %v940_v55  ;;  %vm946_vm3 = vweird.f32 %v940_v55  ;;  %v950_v62 = vand.u32 2147483647, %v940_v55 }
 0xc35   :  { %v953_v0 = vor.u32 1.1754944e-38, %v952_v61  ;;  %vm951_vm5 = vcmp.eq.f32.partialorder %v950_v62, 8.507059e+37 }
 0xc39   :  { %v1665_v56 = vpop.eup %1664 }
 0xc3a   :  { %v942_v57 = vmul.f32 %v1665_v56, %v940_v55  ;;  %vm947_vm2 = vweird.f32 %v1665_v56 }
 0xc3b   :  { %vm948_vm4 = vmor %vm946_vm3, %vm947_vm2 }
 0xc3c   :  { %v943_v58 = vsub.f32 1.0, %v942_v57 }
 0xc3e   :  { %v944_v59 = vmul.f32 %v1665_v56, %v943_v58 }
 0xc40   :  { %v945_v60 = vadd.f32 %v1665_v56, %v944_v59 }
 0xc42   :  { %v949_v63 = vsel %vm948_vm4, %v1665_v56, %v945_v60 }
 0xc43   :  { %v954_v2 = vsel %vm951_vm5, %v953_v0, %v949_v63 }
 0xc44   :  { %v967_v25 = vsub.f32 1.0, %v954_v2  ;;  %v973_v27 = vmul.f32 %v954_v2, %v2134_v30 }
 0xc60   :  { %v1021_v48 = vpop.permute.xlu1 %1020 }
 0xc61   :  { %v1023_v50 = vmul.f32 %v1021_v48, %v1017_v49 }
 0xc63   :  { %1025 = vrot.lane.b32.xlu2 %v1023_v50, %s1810_s28 }
 0xc98   :  { %v958_v1 = vpop.permute.xlu0 %957 }
 0xc99   :  { %v960_v3 = vmul.f32 %v958_v1, %v954_v2 }
 0xc9b   :  { %962 = vrot.lane.b32.xlu2 %v960_v3, %s1810_s28 }
 0xcbd   :  { %v1026_v4 = vpop.permute.xlu2 %1025 }
 0xcbe   :  { %v1028_v5 = vadd.f32 %v1026_v4, %v976_v11 }
 0xcc0   :  { %1666 = vtanh.f32 %v1028_v5 }
 0xcc6   :  { %v1667_v6 = vpop.eup %1666 }
 0xcc7   :  { %1032 = vrot.lane.b32.xlu1 %v1667_v6, %s1811_s29 }
 0xcf5   :  { %v963_v7 = vpop.permute.xlu2 %962 }
 0xcf6   :  { %v965_v8 = vadd.f32 %v963_v7, %v913_v51 }
 0xcf8   :  { %1668 = vtanh.f32 %v965_v8 }
 0xcfe   :  { %v1669_v13 = vpop.eup %1668 }
 0xcff   :  { %969 = vrot.lane.b32.xlu1 %v1669_v13, %s1811_s29 }
 0xd39   :  { %v1033_v19 = vpop.permute.xlu1 %1032 }
 0xd3a   :  { %v1035_v21 = vmul.f32 %v1033_v19, %v1030_v18 }
 0xd3c   :  { %v2162_v23 = vadd.f32 %v1036_v20, %v1035_v21 }
 0xd3e   :  { %1045 = vrot.lane.b32.xlu0 %v2162_v23, %s1811_s29 }
 0xd71   :  { %v970_v26 = vpop.permute.xlu1 %969 }
 0xd72   :  { %v972_v29 = vmul.f32 %v970_v26, %v967_v25  ;;  %v1251_v26 = vld [vmem:[#allocation3] sm:$0xff] }
 0xd74   :  { %v2167_v31 = vadd.f32 %v973_v27, %v972_v29 }
 0xd76   :  { %1039 = vrot.lane.b32.xlu2 %v2167_v31, %s1811_s29 }
 0xdb0   :  { %v1046_v32 = vpop.permute.xlu0 %1045 }
 0xdb1   :  { %1049 = vst.msk [vmem:[#allocation5 + $0x10] sm:$0xff] %vm89_vm0, %v1046_v32  ;;  %1558 = vmatmul.msk.f32.vlgmr.msrb.gmra.mxu3 %vm89_vm0, %v1046_v32 }
 0xdd0   :  { %v1040_v24 = vpop.permute.xlu2 %1039 }
 0xdd1   :  { %1043 = vst.msk [vmem:[#allocation4 + $0x28] sm:$0xff] %vm89_vm0, %v1040_v24  ;;  %1556 = vmatmul.msk.f32.vlgmr.msrb.gmra.mxu2 %vm89_vm0, %v1040_v24 }
 0xdd8   :  { %v1329_v33 = vld [vmem:[#allocation4 + $0x28] sm:$0xff] }
 0xdd9   :  { %1577 = vmatmul.msk.f32.gmra.mxu1 %vm89_vm0, %v1329_v33 }
 0xe34   :  { %v1134_v30 = vpop.f32.mrf.mxu3 }
 0xe35   :  { %1158 = vrot.lane.b32.xlu0 %v1134_v30, %s1810_s28  ;;  %v1137_v38 = vadd.f32 %v1134_v30, %v1114_v37 }
 0xe37   :  { %v1559_v40 = vmul.f32 -1.442695, %v1137_v38 }
 0xe39   :  { %1670 = vpow2.f32 %v1559_v40 }
 0xe3f   :  { %v1671_v35 = vpop.eup %1670 }
 0xe40   :  { %v1141_v22 = vadd.f32 1.0, %v1671_v35 }
 0xe42   :  { %v1153_v44 = vand.u32 2147483648, %v1141_v22  ;;  %vm1147_vm7 = vweird.f32 %v1141_v22  ;;  %v1151_v17 = vand.u32 2147483647, %v1141_v22 }
 0xe44   :  { %v1154_v47 = vor.u32 1.1754944e-38, %v1153_v44  ;;  %vm1152_vm9 = vcmp.eq.f32.partialorder %v1151_v17, 8.507059e+37 }
 0xe54   :  { %v1071_v36 = vpop.f32.mrf.mxu2 }
 0xe55   :  { %1095 = vrot.lane.b32.xlu2 %v1071_v36, %s1810_s28  ;;  %v1074_v34 = vadd.f32 %v1071_v36, %v1051_v28 }
 0xe57   :  { %v1557_v41 = vmul.f32 -1.442695, %v1074_v34 }
 0xe59   :  { %1672 = vpow2.f32 %v1557_v41 }
 0xe5a   :  { %1674 = vrcp.f32 %v1141_v22 }
 0xe5f   :  { %v1673_v9 = vpop.eup %1672 }
 0xe60   :  { %v1078_v11 = vadd.f32 1.0, %v1673_v9  ;;  %v1675_v14 = vpop.eup %1674  ;;  %v1189_v9 = vld [vmem:[#allocation2 + $0x38] sm:$0xff] }
 0xe61   :  { %v1143_v16 = vmul.f32 %v1675_v14, %v1141_v22  ;;  %vm1148_vm6 = vweird.f32 %v1675_v14 }
 0xe62   :  { %1676 = vrcp.f32 %v1078_v11  ;;  %vm1149_vm8 = vmor %vm1147_vm7, %vm1148_vm6  ;;  %v1090_v52 = vand.u32 2147483648, %v1078_v11  ;;  %vm1084_vm11 = vweird.f32 %v1078_v11  ;;  %v1088_v53 = vand.u32 2147483647, %v1078_v11 }
 0xe63   :  { %v1144_v39 = vsub.f32 1.0, %v1143_v16 }
 0xe64   :  { %v1091_v55 = vor.u32 1.1754944e-38, %v1090_v52  ;;  %vm1089_vm12 = vcmp.eq.f32.partialorder %v1088_v53, 8.507059e+37 }
 0xe65   :  { %v1145_v42 = vmul.f32 %v1675_v14, %v1144_v39 }
 0xe67   :  { %v1146_v15 = vadd.f32 %v1675_v14, %v1145_v42 }
 0xe68   :  { %v1677_v10 = vpop.eup %1676 }
 0xe69   :  { %v1080_v12 = vmul.f32 %v1677_v10, %v1078_v11  ;;  %v1150_v45 = vsel %vm1149_vm8, %v1675_v14, %v1146_v15  ;;  %vm1085_vm10 = vweird.f32 %v1677_v10 }
 0xe6a   :  { %v1155_v49 = vsel %vm1152_vm9, %v1154_v47, %v1150_v45  ;;  %vm1086_vm1 = vmor %vm1084_vm11, %vm1085_vm10 }
 0xe6b   :  { %v1081_v43 = vsub.f32 1.0, %v1080_v12  ;;  %v1168_v1 = vsub.f32 1.0, %v1155_v49  ;;  %v1174_v3 = vmul.f32 %v1155_v49, %v2162_v23 }
 0xe6d   :  { %v1082_v46 = vmul.f32 %v1677_v10, %v1081_v43 }
 0xe6f   :  { %v1083_v51 = vadd.f32 %v1677_v10, %v1082_v46 }
 0xe71   :  { %v1087_v54 = vsel %vm1086_vm1, %v1677_v10, %v1083_v51 }
 0xe72   :  { %v1092_v57 = vsel %vm1089_vm12, %v1091_v55, %v1087_v54 }
 0xe73   :  { %v1105_v6 = vsub.f32 1.0, %v1092_v57  ;;  %v1111_v8 = vmul.f32 %v1092_v57, %v2167_v31 }
 0xea7   :  { %v1159_v48 = vpop.permute.xlu0 %1158 }
 0xea8   :  { %v1161_v50 = vmul.f32 %v1159_v48, %v1155_v49 }
 0xeaa   :  { %1163 = vrot.lane.b32.xlu1 %v1161_v50, %s1810_s28 }
 0xeaf   :  { %v1096_v56 = vpop.permute.xlu2 %1095 }
 0xeb0   :  { %v1098_v58 = vmul.f32 %v1096_v56, %v1092_v57 }
 0xeb2   :  { %1100 = vrot.lane.b32.xlu1 %v1098_v58, %s1810_s28 }
 0xf1c   :  { %v1164_v59 = vpop.permute.xlu1 %1163 }
 0xf1d   :  { %v1166_v60 = vadd.f32 %v1164_v59, %v1114_v37 }
 0xf1f   :  { %1678 = vtanh.f32 %v1166_v60 }
 0xf24   :  { %v1101_v61 = vpop.permute.xlu1 %1100 }
 0xf25   :  { %v1679_v62 = vpop.eup %1678  ;;  %v1103_v63 = vadd.f32 %v1101_v61, %v1051_v28  ;;  %v1347_v61 = vld [vmem:[#allocation11 + $0x18] sm:$0xff] }
 0xf26   :  { %1170 = vrot.lane.b32.xlu0 %v1679_v62, %s1811_s29  ;;  %v1346_v62 = vld [vmem:[#allocation11 + $0x10] sm:$0xff]  ;;  %1384 = vmatpush.msrb.mxu0 %v1347_v61 }
 0xf27   :  { %1680 = vtanh.f32 %v1103_v63  ;;  %v1345_v63 = vld [vmem:[#allocation11 + $0x8] sm:$0xff] }
 0xf28   :  { %1385 = vmatpush.msrb.mxu0 %v1346_v62 }
 0xf2a   :  { %1386 = vmatpush.msrb.mxu0 %v1345_v63 }
 0xf2d   :  { %v1681_v0 = vpop.eup %1680 }
 0xf2e   :  { %1107 = vrot.lane.b32.xlu0 %v1681_v0, %s1811_s29 }
 0xf98   :  { %v1171_v2 = vpop.permute.xlu0 %1170 }
 0xf99   :  { %v1173_v4 = vmul.f32 %v1171_v2, %v1168_v1 }
 0xf9b   :  { %v2183_v5 = vadd.f32 %v1174_v3, %v1173_v4 }
 0xf9d   :  { %1183 = vrot.lane.b32.xlu2 %v2183_v5, %s1811_s29 }
 0xfa0   :  { %v1108_v7 = vpop.permute.xlu0 %1107 }
 0xfa1   :  { %v1110_v13 = vmul.f32 %v1108_v7, %v1105_v6  ;;  %v1344_v6 = vld [vmem:[#allocation11] sm:$0xff] }
 0xfa2   :  { %1387 = vmatpush.msrb.mxu0 %v1344_v6 }
 0xfa3   :  { %v2188_v18 = vadd.f32 %v1111_v8, %v1110_v13  ;;  %v1338_v13 = vld [vmem:[#allocation5 + $0x10] sm:$0xff] }
 0xfa5   :  { %1177 = vrot.lane.b32.xlu1 %v2188_v18, %s1811_s29 }
 0xff7   :  { %v1184_v19 = vpop.permute.xlu2 %1183 }
 0xff8   :  { %1187 = vst.msk [vmem:[#allocation5 + $0x8] sm:$0xff] %vm89_vm0, %v1184_v19  ;;  %1562 = vmatmul.msk.f32.vlgmr.msra.gmra.mxu3 %vm89_vm0, %v1184_v19  ;;  %v1339_v19 = vld [vmem:[#allocation5 + $0x18] sm:$0xff] }
 0xfff   :  { %v1337_v8 = vld [vmem:[#allocation5 + $0x8] sm:$0xff] }
0x1017   :  { %v1178_v20 = vpop.permute.xlu1 %1177 }
0x1018   :  { %1181 = vst.msk [vmem:[#allocation4 + $0x30] sm:$0xff] %vm89_vm0, %v1178_v20  ;;  %1560 = vmatmul.msk.f32.vlgmr.msra.gmra.mxu2 %vm89_vm0, %v1178_v20  ;;  %v1341_v20 = vld [vmem:[#allocation5 + $0x28] sm:$0xff] }
0x101f   :  { %v1330_v21 = vld [vmem:[#allocation4 + $0x30] sm:$0xff] }
0x1020   :  { %1578 = vmatmul.msk.f32.gmra.mxu1 %vm89_vm0, %v1330_v21 }
0x107b   :  { %v1271_v23 = vpop.f32.mrf.mxu3 }
0x107c   :  { %1295 = vrot.lane.b32.xlu2 %v1271_v23, %s1810_s28  ;;  %v1274_v27 = vadd.f32 %v1271_v23, %v1251_v26  ;;  %v1342_v23 = vld [vmem:[#allocation5 + $0x30] sm:$0xff] }
0x107e   :  { %v1563_v29 = vmul.f32 -1.442695, %v1274_v27  ;;  %v1597_v27 = vld [vmem:[%s2234_s7] ss:$0 sm:$0xff]  ;;  %s1812_s7 = smov [#allocation12]  }
0x107f   :  { %s1502_s20 = sshll.u32 %s1812_s7, 4  ;;  %s1503_s20 = int_to_ptr.vmem [resolvable:$true] %s1502_s20 }
0x1080   :  { %1682 = vpow2.f32 %v1563_v29  ;;  %v1454_v29 = vpop.f32.mrf.mxu1 }
0x1086   :  { %v1683_v31 = vpop.eup %1682 }
0x1087   :  { %v1278_v32 = vadd.f32 1.0, %v1683_v31 }
0x1089   :  { %1684 = vrcp.f32 %v1278_v32  ;;  %v1290_v38 = vand.u32 2147483648, %v1278_v32  ;;  %vm1284_vm14 = vweird.f32 %v1278_v32  ;;  %v1288_v40 = vand.u32 2147483647, %v1278_v32 }
0x108b   :  { %v1291_v34 = vor.u32 1.1754944e-38, %v1290_v38  ;;  %vm1289_vm2 = vcmp.eq.f32.partialorder %v1288_v40, 8.507059e+37 }
0x108f   :  { %v1685_v24 = vpop.eup %1684 }
0x1090   :  { %v1280_v33 = vmul.f32 %v1685_v24, %v1278_v32  ;;  %vm1285_vm13 = vweird.f32 %v1685_v24 }
0x1091   :  { %vm1286_vm15 = vmor %vm1284_vm14, %vm1285_vm13 }
0x1092   :  { %v1281_v30 = vsub.f32 1.0, %v1280_v33  ;;  %v1457_v33 = vpop.f32.mrf.mxu1 }
0x1094   :  { %v1282_v36 = vmul.f32 %v1685_v24, %v1281_v30 }
0x1096   :  { %v1283_v37 = vadd.f32 %v1685_v24, %v1282_v36 }
0x1098   :  { %v1287_v28 = vsel %vm1286_vm15, %v1685_v24, %v1283_v37 }
0x1099   :  { %v1292_v35 = vsel %vm1289_vm2, %v1291_v34, %v1287_v28 }
0x109a   :  { %v1305_v56 = vsub.f32 1.0, %v1292_v35  ;;  %v1311_v58 = vmul.f32 %v1292_v35, %v2183_v5  ;;  %v1460_v38 = vpop.f32.mrf.mxu1 }
0x109b   :  { %v1209_v25 = vpop.f32.mrf.mxu2 }
0x109c   :  { %1233 = vrot.lane.b32.xlu1 %v1209_v25, %s1810_s28  ;;  %v1212_v11 = vadd.f32 %v1209_v25, %v1189_v9  ;;  %v1343_v25 = vld [vmem:[#allocation5 + $0x38] sm:$0xff] }
0x109e   :  { %v1561_v14 = vmul.f32 -1.442695, %v1212_v11 }
0x10a0   :  { %1686 = vpow2.f32 %v1561_v14 }
0x10a6   :  { %v1687_v16 = vpop.eup %1686 }
0x10a7   :  { %v1216_v39 = vadd.f32 1.0, %v1687_v16 }
0x10a9   :  { %1688 = vrcp.f32 %v1216_v39  ;;  %v1228_v44 = vand.u32 2147483648, %v1216_v39  ;;  %vm1222_vm4 = vweird.f32 %v1216_v39  ;;  %v1226_v17 = vand.u32 2147483647, %v1216_v39 }
0x10ab   :  { %v1229_v46 = vor.u32 1.1754944e-38, %v1228_v44  ;;  %vm1227_vm6 = vcmp.eq.f32.partialorder %v1226_v17, 8.507059e+37 }
0x10af   :  { %v1689_v10 = vpop.eup %1688 }
0x10b0   :  { %v1218_v42 = vmul.f32 %v1689_v10, %v1216_v39  ;;  %vm1223_vm3 = vweird.f32 %v1689_v10 }
0x10b1   :  { %vm1224_vm5 = vmor %vm1222_vm4, %vm1223_vm3 }
0x10b2   :  { %v1219_v12 = vsub.f32 1.0, %v1218_v42 }
0x10b4   :  { %v1220_v15 = vmul.f32 %v1689_v10, %v1219_v12 }
0x10b6   :  { %v1221_v43 = vadd.f32 %v1689_v10, %v1220_v15 }
0x10b8   :  { %v1225_v45 = vsel %vm1224_vm5, %v1689_v10, %v1221_v43 }
0x10b9   :  { %v1230_v48 = vsel %vm1227_vm6, %v1229_v46, %v1225_v45 }
0x10ba   :  { %v1243_v0 = vsub.f32 1.0, %v1230_v48  ;;  %v1249_v2 = vmul.f32 %v1230_v48, %v2188_v18  ;;  %v1340_v18 = vld [vmem:[#allocation5 + $0x20] sm:$0xff] }
0x10d6   :  { %v1296_v41 = vpop.permute.xlu2 %1295 }
0x10d7   :  { %v1298_v22 = vmul.f32 %v1296_v41, %v1292_v35  ;;  %v1463_v41 = vpop.f32.mrf.mxu1 }
0x10d9   :  { %1300 = vrot.lane.b32.xlu0 %v1298_v22, %s1810_s28 }
0x10df   :  { %v1466_v11 = vpop.f32.mrf.mxu1 }
0x10e7   :  { %v1469_v10 = vpop.f32.mrf.mxu1 }
0x10ef   :  { %v1472_v43 = vpop.f32.mrf.mxu1 }
0x110e   :  { %v1234_v47 = vpop.permute.xlu1 %1233 }
0x110f   :  { %v1236_v49 = vmul.f32 %v1234_v47, %v1230_v48 }
0x1111   :  { %1238 = vrot.lane.b32.xlu0 %v1236_v49, %s1810_s28 }
0x114b   :  { %v1301_v50 = vpop.permute.xlu0 %1300 }
0x114c   :  { %v1303_v51 = vadd.f32 %v1301_v50, %v1251_v26 }
0x114e   :  { %1690 = vtanh.f32 %v1303_v51 }
0x1154   :  { %v1691_v52 = vpop.eup %1690 }
0x1155   :  { %1307 = vrot.lane.b32.xlu2 %v1691_v52, %s1811_s29 }
0x1183   :  { %v1239_v53 = vpop.permute.xlu0 %1238 }
0x1184   :  { %v1241_v54 = vadd.f32 %v1239_v53, %v1189_v9 }
0x1186   :  { %1692 = vtanh.f32 %v1241_v54 }
0x118c   :  { %v1693_v55 = vpop.eup %1692 }
0x118d   :  { %1245 = vrot.lane.b32.xlu2 %v1693_v55, %s1811_s29 }
0x11af   :  { %v1308_v57 = vpop.permute.xlu2 %1307 }
0x11b0   :  { %v1310_v59 = vmul.f32 %v1308_v57, %v1305_v56 }
0x11b2   :  { %v1312_v60 = vadd.f32 %v1311_v58, %v1310_v59 }
0x11b4   :  { %1320 = vrot.lane.b32.xlu1 %v1312_v60, %s1811_s29 }
0x11e7   :  { %v1246_v1 = vpop.permute.xlu2 %1245 }
0x11e8   :  { %v1248_v3 = vmul.f32 %v1246_v1, %v1243_v0 }
0x11ea   :  { %v1250_v4 = vadd.f32 %v1249_v2, %v1248_v3 }
0x11ec   :  { %1314 = vrot.lane.b32.xlu0 %v1250_v4, %s1811_s29 }
0x1226   :  { %v1321_v5 = vpop.permute.xlu1 %1320 }
0x1227   :  { %1323 = vst.msk [vmem:[#allocation5] sm:$0xff] %vm89_vm0, %v1321_v5 }
0x122e   :  { %v1336_v7 = vld [vmem:[#allocation5] sm:$0xff] }
0x122f   :  { %1564 = vmatmul.msk.f32.vlgmr.msrb.gmra.mxu0 %vm89_vm0, %v1336_v7 }
0x1237   :  { %1565 = vmatmul.msk.f32.gmra.mxu0 %vm89_vm0, %v1337_v8 }
0x123f   :  { %1566 = vmatmul.msk.f32.gmra.mxu0 %vm89_vm0, %v1338_v13 }
0x1247   :  { %1567 = vmatmul.msk.f32.gmra.mxu0 %vm89_vm0, %v1339_v19 }
0x124f   :  { %1568 = vmatmul.msk.f32.gmra.mxu0 %vm89_vm0, %v1340_v18 }
0x1257   :  { %1569 = vmatmul.msk.f32.gmra.mxu0 %vm89_vm0, %v1341_v20 }
0x125e   :  { %v1315_v21 = vpop.permute.xlu0 %1314 }
0x125f   :  { %1318 = vst.msk [vmem:[#allocation4 + $0x38] sm:$0xff] %vm89_vm0, %v1315_v21  ;;  %1570 = vmatmul.msk.f32.gmra.mxu0 %vm89_vm0, %v1342_v23 }
0x1266   :  { %v1331_v26 = vld [vmem:[#allocation4 + $0x38] sm:$0xff] }
0x1267   :  { %1571 = vmatmul.msk.f32.gmra.mxu0 %vm89_vm0, %v1343_v25  ;;  %1579 = vmatmul.msk.f32.gmra.mxu1 %vm89_vm0, %v1331_v26 }
0x12ac   :  { %v1389_v31 = vpop.f32.mrf.mxu0 }
0x12ad   :  { %v1455_v32 = vadd.f32 %v1454_v29, %v1389_v31 }
0x12af   :  { %v1482_v24 = vadd.f32 %v1597_v27, %v1455_v32 }
0x12b1   :  { %1490 = vst [vmem:[#allocation12] sm:$0xff] %v1482_v24 }
0x12b4   :  { %v1392_v30 = vpop.f32.mrf.mxu0 }
0x12b5   :  { %v1458_v36 = vadd.f32 %v1457_v33, %v1392_v30 }
0x12b7   :  { %v1483_v37 = vadd.f32 %v1597_v27, %v1458_v36 }
0x12b9   :  { %1491 = vst [vmem:[#allocation12 + $0x8] sm:$0xff] %v1483_v37 }
0x12bc   :  { %v1395_v40 = vpop.f32.mrf.mxu0 }
0x12bd   :  { %v1461_v28 = vadd.f32 %v1460_v38, %v1395_v40 }
0x12bf   :  { %v1484_v34 = vadd.f32 %v1597_v27, %v1461_v28 }
0x12c1   :  { %1492 = vst [vmem:[#allocation12 + $0x10] sm:$0xff] %v1484_v34 }
0x12c4   :  { %v1398_v35 = vpop.f32.mrf.mxu0 }
0x12c5   :  { %v1464_v22 = vadd.f32 %v1463_v41, %v1398_v35 }
0x12c7   :  { %v1485_v9 = vadd.f32 %v1597_v27, %v1464_v22 }
0x12c9   :  { %1493 = vst [vmem:[#allocation12 + $0x18] sm:$0xff] %v1485_v9 }
0x12cc   :  { %v1401_v14 = vpop.f32.mrf.mxu0 }
0x12cd   :  { %v1467_v16 = vadd.f32 %v1466_v11, %v1401_v14 }
0x12cf   :  { %v1486_v39 = vadd.f32 %v1597_v27, %v1467_v16 }
0x12d1   :  { %1494 = vst [vmem:[#allocation12 + $0x20] sm:$0xff] %v1486_v39 }
0x12d4   :  { %v1404_v42 = vpop.f32.mrf.mxu0 }
0x12d5   :  { %v1470_v12 = vadd.f32 %v1469_v10, %v1404_v42 }
0x12d7   :  { %v1487_v15 = vadd.f32 %v1597_v27, %v1470_v12 }
0x12d9   :  { %1495 = vst [vmem:[#allocation12 + $0x28] sm:$0xff] %v1487_v15 }
0x12dc   :  { %v1407_v44 = vpop.f32.mrf.mxu0 }
0x12dd   :  { %v1473_v17 = vadd.f32 %v1472_v43, %v1407_v44 }
0x12df   :  { %v1488_v45 = vadd.f32 %v1597_v27, %v1473_v17 }
0x12e1   :  { %1496 = vst [vmem:[#allocation12 + $0x30] sm:$0xff] %v1488_v45 }
0x12e4   :  { %v1410_v46 = vpop.f32.mrf.mxu0  ;;  %v1475_v47 = vpop.f32.mrf.mxu1 }
0x12e5   :  { %v1476_v48 = vadd.f32 %v1475_v47, %v1410_v46 }
0x12e7   :  { %v1489_v49 = vadd.f32 %v1597_v27, %v1476_v48 }
0x12e9   :  { %1497 = vst [vmem:[#allocation12 + $0x38] sm:$0xff] %v1489_v49 }
0x12ea   :  { %1510 = dma.vmem_to_hbm [thread:$0]  %s1503_s20, 1024, %s1505_s22, [#allocation8], %s1805_s13, %s1805_s13, %s1806_s14  }
0x12eb   :  { %1802 = dma.done.wait [#allocation8], 1024  }
0x12ec   :  { %1803 = vsyncadd [#allocation8], 4294966272 }
0x12ed   :  { %1515 = vsyncpa [#allocation7], 1 }
0x12ee   :  { %1516 = vsyncpa [#allocation10], 1 }
0x12ef   :  { %1517 = vsyncpa [#allocation8], 1 }

</bundles_post_ra>
